<compile_context>
chip_gen: v5e
topology: v5e:2x2
jax: 0.10.0
libtpu: 0.0.40
codegen_flags: <defaults>
</compile_context>

<pallas_src>
import functools

import jax
import jax.numpy as jnp
from jax import lax
from jax.experimental import pallas as pl
from jax.experimental.pallas import tpu as pltpu


def _round_up(x, m):
    return ((x + m - 1) // m) * m


def _head_kernel(x_ref, dww_ref, b1_ref, pw_ref, b2_ref, hw_ref, hb_ref,
                 o_ref, win_ref, *, H, W, C, CP, OP, T, P, S, F):
    """One (batch, row-tile) per grid step.

    x_ref  : (H*W, C)      pixel-major (row-major HxW) input for this batch
    dww_ref: (9, C)        depthwise taps, row = 3*dy+dx, BN1 scale folded in
    b1_ref : (1, C)        BN1 bias
    pw_ref : (C, CP)       1x1 conv weights (Cin, Cout), BN2 scale folded, lane-padded
    b2_ref : (1, CP)       BN2 bias (lane-padded with zeros)
    hw_ref : (CP, OP)      head 1x1 weights (lane-padded)
    hb_ref : (1, OP)       head bias (lane-padded)
    o_ref  : (T, W, OP)    output tile (last dim 128-lane dense)
    win_ref: (F+S+F, C)    VMEM scratch: halo'd pixel window for this row tile
                           (T = tile_h rows, P = T*W pixels, S = (T+2)*W)
    """
    ht = pl.program_id(1)
    nh = pl.num_programs(1)
    p0 = pl.multiple_of(ht * P, P)          # first center pixel of this tile

    # ---- build the halo'd pixel window in VMEM (no HBM-side padding) -------
    # Layout: [F dead cells | top halo row | T center rows | bottom halo | F dead]
    # The F dead cells are NOT initialized: the only reads touching them are
    # the masked-out edge lanes of the dx-shifted variants below (select
    # replaces them before any arithmetic uses them).
    top = x_ref[pl.ds(jnp.maximum(p0 - W, 0), W), :]            # image row h0-1
    win_ref[F:F + W, :] = jnp.where(ht > 0, top, 0.0)
    win_ref[F + W:F + W + P, :] = x_ref[pl.ds(p0, P), :]        # rows h0..h0+T-1
    bot = x_ref[pl.ds(jnp.minimum(p0 + P, (H - 1) * W), W), :]  # image row h0+T
    win_ref[F + W + P:F + S, :] = jnp.where(ht + 1 < nh, bot, 0.0)
    win = win_ref[...]                                          # (F+S+F, C)

    # ---- depthwise 3x3: pre-stack the 3 dx-shifted variants once -----------
    # Column-validity mask (w == 0 / w == W-1 edges) built without integer mod.
    wcol = lax.broadcasted_iota(jnp.int32, (T + 2, W, C), 1).reshape(S, C)
    x_m1 = jnp.where(wcol > 0, win[F - 1:F - 1 + S], 0.0)       # source col w-1
    x_00 = win[F:F + S]                                         # source col w
    x_p1 = jnp.where(wcol < W - 1, win[F + 1:F + 1 + S], 0.0)   # source col w+1
    xs = (x_m1, x_00, x_p1)

    taps = dww_ref[...]                                         # (9, C)
    acc = None
    for dy in range(3):
        for dx in range(3):
            # per-dy slices are at static multiples of W (vreg-aligned),
            # reusing the 3 pre-built dx variants.
            t = xs[dx][dy * W:dy * W + P] * taps[3 * dy + dx]
            acc = t if acc is None else acc + t

    # BN1 bias + ReLU (BN1 scale already folded into the taps).
    y = jnp.maximum(acc + b1_ref[...], 0.0)                     # (P, C)

    # ---- 1x1 conv (BN2 scale folded) + bias + ReLU, head 1x1 + bias (MXU) --
    # TODO(synk): for production-sized C (>=64/128) cast y / pw / hw to bf16
    # here (keep f32 accumulation) to double MXU throughput on v6e/v7x, and
    # pick the lane-pad target (128 vs 256) per generation via get_tpu_info().
    y = jnp.dot(y, pw_ref[...], preferred_element_type=jnp.float32) + b2_ref[...]
    y = jnp.maximum(y, 0.0)                                     # (P, CP)
    y = jnp.dot(y, hw_ref[...], preferred_element_type=jnp.float32) + hb_ref[...]
    o_ref[...] = y.reshape(T, W, OP)                            # lane-dense store


def _pack_params(params):
    """Fold BN scales into the conv weights and lane-pad for the kernel."""
    C = params["pw_w"].shape[0]
    OutC = params["head_w"].shape[1]
    CP = _round_up(C, 128)
    OP = _round_up(OutC, 128)

    dw = (params["dw_w"] * params["s1"]).astype(jnp.float32)      # (9, C)
    b1 = params["b1"].astype(jnp.float32)                         # (1, C)
    pw = params["pw_w"] * params["s2"]                            # (C, C), col j scaled
    pw_p = jnp.zeros((C, CP), jnp.float32).at[:, :C].set(pw)
    b2_p = jnp.zeros((1, CP), jnp.float32).at[:, :C].set(params["b2"])
    hw_p = jnp.zeros((CP, OP), jnp.float32).at[:C, :OutC].set(params["head_w"])
    hb_p = jnp.zeros((1, OP), jnp.float32).at[:, :OutC].set(params["head_b"])
    return dw, b1, pw_p, b2_p, hw_p, hb_p


def head_module_forward(x_nchw, params, tile_h=None):
    """Pallas implementation of HeadModule.forward (has_ext=True)."""
    B, C, H, W = x_nchw.shape
    OutC = params["head_w"].shape[1]
    if tile_h is None:
        tile_h = 8 if H % 8 == 0 else H
    assert H % tile_h == 0, (H, tile_h)

    T = tile_h
    P = T * W                    # pixels per output tile
    S = (T + 2) * W              # pixels per halo'd window
    F = 8                        # dead cells keeping window stores vreg-aligned

    dw, b1, pw_p, b2_p, hw_p, hb_p = _pack_params(params)
    CP, OP = pw_p.shape[1], hw_p.shape[1]

    # NCHW -> NHWC -> pixel-major (H*W, C); channels stay on the lane axis.
    # No halo padding in HBM (halo is synthesized in-kernel).
    x_pm = jnp.transpose(x_nchw, (0, 2, 3, 1)).astype(jnp.float32).reshape(B, H * W, C)

    kernel = functools.partial(_head_kernel, H=H, W=W, C=C, CP=CP, OP=OP,
                               T=T, P=P, S=S, F=F)

    # NOTE: the input block stays whole-image per batch (resident across the
    # h-tiles) because halo-overlapping blocks are not expressible with a plain
    # BlockSpec; for very large images switch to memory_space=pl.ANY + manual
    # halo DMA.
    out = pl.pallas_call(
        kernel,
        out_shape=jax.ShapeDtypeStruct((B, H, W, OP), jnp.float32),
        grid=(B, H // T),
        in_specs=[
            pl.BlockSpec((None, H * W, C), lambda b, h: (b, 0, 0)),
            pl.BlockSpec((9, C), lambda b, h: (0, 0)),
            pl.BlockSpec((1, C), lambda b, h: (0, 0)),
            pl.BlockSpec((C, CP), lambda b, h: (0, 0)),
            pl.BlockSpec((1, CP), lambda b, h: (0, 0)),
            pl.BlockSpec((CP, OP), lambda b, h: (0, 0)),
            pl.BlockSpec((1, OP), lambda b, h: (0, 0)),
        ],
        out_specs=pl.BlockSpec((None, T, W, OP), lambda b, h: (b, h, 0, 0)),
        scratch_shapes=[pltpu.VMEM((F + S + F, C), jnp.float32)],
        compiler_params=pltpu.CompilerParams(
            dimension_semantics=("parallel", "parallel"),
            vmem_limit_bytes=32 * 1024 * 1024),
    )(x_pm, dw, b1, pw_p, b2_p, hw_p, hb_p)

    # Drop the padded output lanes, back to NCHW.
    return jnp.transpose(out[..., :OutC], (0, 3, 1, 2))


def init_params(key, C, OutC, head_std=0.01, head_bias=0.01, eps=1e-5):
    """Deterministic synthetic parameters matching the module's shapes.

    BatchNorm2d is folded into (scale, bias) using eval-mode statistics:
      scale = gamma / sqrt(var + eps), bias = beta - mean * scale
    """
    ks = jax.random.split(key, 12)

    dw_w = (0.01 * jax.random.normal(ks[0], (3, 3, C))).astype(jnp.float32)
    pw_w = (0.01 * jax.random.normal(ks[1], (C, C))).astype(jnp.float32)
    head_w = (head_std * jax.random.normal(ks[2], (C, OutC))).astype(jnp.float32)
    head_b = jnp.full((1, OutC), head_bias, jnp.float32)

    def fold_bn(kg, kb, km, kv, n):
        gamma = 1.0 + 0.1 * jax.random.normal(kg, (n,))
        beta = 0.1 * jax.random.normal(kb, (n,))
        mean = 0.05 * jax.random.normal(km, (n,))
        var = jnp.abs(1.0 + 0.1 * jax.random.normal(kv, (n,)))
        scale = gamma / jnp.sqrt(var + eps)
        bias = beta - mean * scale
        return scale.astype(jnp.float32), bias.astype(jnp.float32)

    s1, b1 = fold_bn(ks[3], ks[4], ks[5], ks[6], C)
    s2, b2 = fold_bn(ks[7], ks[8], ks[9], ks[10], C)

    return {
        "dw_w": dw_w.reshape(9, C),   # row-major (dy, dx) -> 3*dy+dx
        "pw_w": pw_w,
        "head_w": head_w,
        "head_b": head_b,
        "s1": s1.reshape(1, C),
        "b1": b1.reshape(1, C),
        "s2": s2.reshape(1, C),
        "b2": b2.reshape(1, C),
    }


def reference_forward(x_nchw, params, C):
    """Pure-JAX reference (same math, XLA conv) for correctness check."""
    x = jnp.transpose(x_nchw, (0, 2, 3, 1)).astype(jnp.float32)   # NHWC
    dw = params["dw_w"].reshape(3, 3, 1, C)                       # HWIO, depthwise
    y = lax.conv_general_dilated(
        x, dw, window_strides=(1, 1), padding="SAME",
        dimension_numbers=("NHWC", "HWIO", "NHWC"), feature_group_count=C)
    y = jnp.maximum(y * params["s1"][0] + params["b1"][0], 0.0)
    y = jnp.dot(y, params["pw_w"])
    y = jnp.maximum(y * params["s2"][0] + params["b2"][0], 0.0)
    y = jnp.dot(y, params["head_w"]) + params["head_b"][0]
    return jnp.transpose(y, (0, 3, 1, 2))                          # NCHW


if __name__ == "__main__":
    B, C, H, W = 2, 8, 16, 16
    OutC = 4

    key = jax.random.PRNGKey(0)
    kx, kp = jax.random.split(key)
    x = jax.random.normal(kx, (B, C, H, W), jnp.float32)
    params = init_params(kp, C, OutC)

    out = head_module_forward(x, params)
    out = jax.block_until_ready(out)

    ref = reference_forward(x, params, C)
    assert out.shape == (B, OutC, H, W), out.shape
    err = float(jnp.max(jnp.abs(out - ref)))
    assert jnp.allclose(out, ref, atol=1e-4, rtol=1e-4), err

    print("KERNEL_OK")
</pallas_src>

<mosaic_0001>
module attributes {stable_mosaic.version = 11 : i64} {
  func.func @_head_kernel(%arg0: i32, %arg1: i32, %arg2: memref<1x256x8xf32, #tpu.memory_space<vmem>>, %arg3: memref<9x8xf32, #tpu.memory_space<vmem>>, %arg4: memref<1x8xf32, #tpu.memory_space<vmem>>, %arg5: memref<8x128xf32, #tpu.memory_space<vmem>>, %arg6: memref<1x128xf32, #tpu.memory_space<vmem>>, %arg7: memref<128x128xf32, #tpu.memory_space<vmem>>, %arg8: memref<1x128xf32, #tpu.memory_space<vmem>>, %arg9: memref<1x8x16x128xf32, #tpu.memory_space<vmem>>, %arg10: memref<176x8xf32, #tpu.memory_space<vmem>>) attributes {dimension_semantics = [#tpu.dimension_semantics<parallel>, #tpu.dimension_semantics<parallel>], iteration_bounds = array<i64: 2, 2>, scalar_prefetch = 0 : i64, scratch_operands = 1 : i64, tpu.core_type = #tpu.core_type<tc>, window_params = [{transform_indices = @transform_0, window_bounds = array<i64: 1, 256, 8>}, {pipeline_mode = #tpu.pipeline_mode<synchronous>, transform_indices = @transform_1, window_bounds = array<i64: 9, 8>}, {pipeline_mode = #tpu.pipeline_mode<synchronous>, transform_indices = @transform_2, window_bounds = array<i64: 1, 8>}, {pipeline_mode = #tpu.pipeline_mode<synchronous>, transform_indices = @transform_3, window_bounds = array<i64: 8, 128>}, {pipeline_mode = #tpu.pipeline_mode<synchronous>, transform_indices = @transform_4, window_bounds = array<i64: 1, 128>}, {pipeline_mode = #tpu.pipeline_mode<synchronous>, transform_indices = @transform_5, window_bounds = array<i64: 128, 128>}, {pipeline_mode = #tpu.pipeline_mode<synchronous>, transform_indices = @transform_6, window_bounds = array<i64: 1, 128>}, {transform_indices = @transform_7, window_bounds = array<i64: 1, 8, 16, 128>}]} {
    %c128_i32 = arith.constant 128 : i32
    %0 = arith.muli %arg1, %c128_i32 : i32
    %1 = tpu.assume_multiple %0, 128 : i32
    %c16_i32 = arith.constant 16 : i32
    %2 = arith.subi %1, %c16_i32 : i32
    %c0_i32 = arith.constant 0 : i32
    %3 = arith.maxsi %2, %c0_i32 : i32
    %c0 = arith.constant 0 : index
    %4 = arith.index_cast %3 : i32 to index
    %c0_0 = arith.constant 0 : index
    %5 = vector.load %arg2[%c0, %4, %c0_0] : memref<1x256x8xf32, #tpu.memory_space<vmem>>, vector<1x16x8xf32>
    %6 = vector.shape_cast %5 : vector<1x16x8xf32> to vector<16x8xf32>
    %c0_i32_1 = arith.constant 0 : i32
    %7 = arith.cmpi sgt, %arg1, %c0_i32_1 : i32
    %cst = arith.constant 0.000000e+00 : f32
    %8 = vector.broadcast %cst : f32 to vector<16x8xf32>
    %9 = arith.select %7, %6, %8 : vector<16x8xf32>
    %c8 = arith.constant 8 : index
    %c0_2 = arith.constant 0 : index
    %10 = vector.load %arg10[%c8, %c0_2] : memref<176x8xf32, #tpu.memory_space<vmem>>, vector<16x8xf32>
    tpu.vector_store %arg10[%c8, %c0_2], %9 {strides = array<i32>} : memref<176x8xf32, #tpu.memory_space<vmem>>, vector<16x8xf32>,
    %c0_3 = arith.constant 0 : index
    %11 = arith.index_cast %1 : i32 to index
    %c0_4 = arith.constant 0 : index
    %12 = vector.load %arg2[%c0_3, %11, %c0_4] : memref<1x256x8xf32, #tpu.memory_space<vmem>>, vector<1x128x8xf32>
    %13 = vector.shape_cast %12 : vector<1x128x8xf32> to vector<128x8xf32>
    %c24 = arith.constant 24 : index
    %c0_5 = arith.constant 0 : index
    %14 = vector.load %arg10[%c24, %c0_5] : memref<176x8xf32, #tpu.memory_space<vmem>>, vector<128x8xf32>
    tpu.vector_store %arg10[%c24, %c0_5], %13 {strides = array<i32>} : memref<176x8xf32, #tpu.memory_space<vmem>>, vector<128x8xf32>,
    %c128_i32_6 = arith.constant 128 : i32
    %15 = arith.addi %1, %c128_i32_6 : i32
    %c240_i32 = arith.constant 240 : i32
    %16 = arith.minsi %15, %c240_i32 : i32
    %c0_7 = arith.constant 0 : index
    %17 = arith.index_cast %16 : i32 to index
    %c0_8 = arith.constant 0 : index
    %18 = vector.load %arg2[%c0_7, %17, %c0_8] : memref<1x256x8xf32, #tpu.memory_space<vmem>>, vector<1x16x8xf32>
    %19 = vector.shape_cast %18 : vector<1x16x8xf32> to vector<16x8xf32>
    %c1_i32 = arith.constant 1 : i32
    %20 = arith.addi %arg1, %c1_i32 : i32
    %c2_i32 = arith.constant 2 : i32
    %21 = arith.cmpi slt, %20, %c2_i32 : i32
    %cst_9 = arith.constant 0.000000e+00 : f32
    %22 = vector.broadcast %cst_9 : f32 to vector<16x8xf32>
    %23 = arith.select %21, %19, %22 : vector<16x8xf32>
    %c152 = arith.constant 152 : index
    %c0_10 = arith.constant 0 : index
    %24 = vector.load %arg10[%c152, %c0_10] : memref<176x8xf32, #tpu.memory_space<vmem>>, vector<16x8xf32>
    tpu.vector_store %arg10[%c152, %c0_10], %23 {strides = array<i32>} : memref<176x8xf32, #tpu.memory_space<vmem>>, vector<16x8xf32>,
    %c0_11 = arith.constant 0 : index
    %c0_12 = arith.constant 0 : index
    %25 = vector.load %arg10[%c0_11, %c0_12] : memref<176x8xf32, #tpu.memory_space<vmem>>, vector<176x8xf32>
    %26 = tpu.iota {dimensions = array<i32: 1>} : vector<10x16x8xi32>
    %27 = vector.shape_cast %26 : vector<10x16x8xi32> to vector<160x8xi32>
    %c0_i32_13 = arith.constant 0 : i32
    %28 = vector.broadcast %c0_i32_13 : i32 to vector<160x8xi32>
    %29 = arith.cmpi sgt, %27, %28 : vector<160x8xi32>
    %30 = vector.extract_strided_slice %25 {offsets = [7, 0], sizes = [160, 8], strides = [1, 1]} : vector<176x8xf32> to vector<160x8xf32>
    %cst_14 = arith.constant 0.000000e+00 : f32
    %31 = vector.broadcast %cst_14 : f32 to vector<160x8xf32>
    %32 = arith.select %29, %30, %31 : vector<160x8xi1>, vector<160x8xf32>
    %33 = vector.extract_strided_slice %25 {offsets = [8, 0], sizes = [160, 8], strides = [1, 1]} : vector<176x8xf32> to vector<160x8xf32>
    %c15_i32 = arith.constant 15 : i32
    %34 = vector.broadcast %c15_i32 : i32 to vector<160x8xi32>
    %35 = arith.cmpi slt, %27, %34 : vector<160x8xi32>
    %36 = vector.extract_strided_slice %25 {offsets = [9, 0], sizes = [160, 8], strides = [1, 1]} : vector<176x8xf32> to vector<160x8xf32>
    %cst_15 = arith.constant 0.000000e+00 : f32
    %37 = vector.broadcast %cst_15 : f32 to vector<160x8xf32>
    %38 = arith.select %35, %36, %37 : vector<160x8xi1>, vector<160x8xf32>
    %c0_16 = arith.constant 0 : index
    %c0_17 = arith.constant 0 : index
    %39 = vector.load %arg3[%c0_16, %c0_17] : memref<9x8xf32, #tpu.memory_space<vmem>>, vector<9x8xf32>
    %40 = vector.extract_strided_slice %32 {offsets = [0, 0], sizes = [128, 8], strides = [1, 1]} : vector<160x8xf32> to vector<128x8xf32>
    %41 = vector.extract_strided_slice %39 {offsets = [0, 0], sizes = [1, 8], strides = [1, 1]} : vector<9x8xf32> to vector<1x8xf32>
    %42 = vector.shape_cast %41 : vector<1x8xf32> to vector<8xf32>
    %43 = vector.shape_cast %42 : vector<8xf32> to vector<1x8xf32>
    %44 = vector.broadcast %43 : vector<1x8xf32> to vector<128x8xf32>
    %45 = arith.mulf %40, %44 : vector<128x8xf32>
    %46 = vector.extract_strided_slice %33 {offsets = [0, 0], sizes = [128, 8], strides = [1, 1]} : vector<160x8xf32> to vector<128x8xf32>
    %47 = vector.extract_strided_slice %39 {offsets = [1, 0], sizes = [1, 8], strides = [1, 1]} : vector<9x8xf32> to vector<1x8xf32>
    %48 = vector.shape_cast %47 : vector<1x8xf32> to vector<8xf32>
    %49 = vector.shape_cast %48 : vector<8xf32> to vector<1x8xf32>
    %50 = vector.broadcast %49 : vector<1x8xf32> to vector<128x8xf32>
    %51 = arith.mulf %46, %50 : vector<128x8xf32>
    %52 = arith.addf %45, %51 : vector<128x8xf32>
    %53 = vector.extract_strided_slice %38 {offsets = [0, 0], sizes = [128, 8], strides = [1, 1]} : vector<160x8xf32> to vector<128x8xf32>
    %54 = vector.extract_strided_slice %39 {offsets = [2, 0], sizes = [1, 8], strides = [1, 1]} : vector<9x8xf32> to vector<1x8xf32>
    %55 = vector.shape_cast %54 : vector<1x8xf32> to vector<8xf32>
    %56 = vector.shape_cast %55 : vector<8xf32> to vector<1x8xf32>
    %57 = vector.broadcast %56 : vector<1x8xf32> to vector<128x8xf32>
    %58 = arith.mulf %53, %57 : vector<128x8xf32>
    %59 = arith.addf %52, %58 : vector<128x8xf32>
    %60 = vector.extract_strided_slice %32 {offsets = [16, 0], sizes = [128, 8], strides = [1, 1]} : vector<160x8xf32> to vector<128x8xf32>
    %61 = vector.extract_strided_slice %39 {offsets = [3, 0], sizes = [1, 8], strides = [1, 1]} : vector<9x8xf32> to vector<1x8xf32>
    %62 = vector.shape_cast %61 : vector<1x8xf32> to vector<8xf32>
    %63 = vector.shape_cast %62 : vector<8xf32> to vector<1x8xf32>
    %64 = vector.broadcast %63 : vector<1x8xf32> to vector<128x8xf32>
    %65 = arith.mulf %60, %64 : vector<128x8xf32>
    %66 = arith.addf %59, %65 : vector<128x8xf32>
    %67 = vector.extract_strided_slice %33 {offsets = [16, 0], sizes = [128, 8], strides = [1, 1]} : vector<160x8xf32> to vector<128x8xf32>
    %68 = vector.extract_strided_slice %39 {offsets = [4, 0], sizes = [1, 8], strides = [1, 1]} : vector<9x8xf32> to vector<1x8xf32>
    %69 = vector.shape_cast %68 : vector<1x8xf32> to vector<8xf32>
    %70 = vector.shape_cast %69 : vector<8xf32> to vector<1x8xf32>
    %71 = vector.broadcast %70 : vector<1x8xf32> to vector<128x8xf32>
    %72 = arith.mulf %67, %71 : vector<128x8xf32>
    %73 = arith.addf %66, %72 : vector<128x8xf32>
    %74 = vector.extract_strided_slice %38 {offsets = [16, 0], sizes = [128, 8], strides = [1, 1]} : vector<160x8xf32> to vector<128x8xf32>
    %75 = vector.extract_strided_slice %39 {offsets = [5, 0], sizes = [1, 8], strides = [1, 1]} : vector<9x8xf32> to vector<1x8xf32>
    %76 = vector.shape_cast %75 : vector<1x8xf32> to vector<8xf32>
    %77 = vector.shape_cast %76 : vector<8xf32> to vector<1x8xf32>
    %78 = vector.broadcast %77 : vector<1x8xf32> to vector<128x8xf32>
    %79 = arith.mulf %74, %78 : vector<128x8xf32>
    %80 = arith.addf %73, %79 : vector<128x8xf32>
    %81 = vector.extract_strided_slice %32 {offsets = [32, 0], sizes = [128, 8], strides = [1, 1]} : vector<160x8xf32> to vector<128x8xf32>
    %82 = vector.extract_strided_slice %39 {offsets = [6, 0], sizes = [1, 8], strides = [1, 1]} : vector<9x8xf32> to vector<1x8xf32>
    %83 = vector.shape_cast %82 : vector<1x8xf32> to vector<8xf32>
    %84 = vector.shape_cast %83 : vector<8xf32> to vector<1x8xf32>
    %85 = vector.broadcast %84 : vector<1x8xf32> to vector<128x8xf32>
    %86 = arith.mulf %81, %85 : vector<128x8xf32>
    %87 = arith.addf %80, %86 : vector<128x8xf32>
    %88 = vector.extract_strided_slice %33 {offsets = [32, 0], sizes = [128, 8], strides = [1, 1]} : vector<160x8xf32> to vector<128x8xf32>
    %89 = vector.extract_strided_slice %39 {offsets = [7, 0], sizes = [1, 8], strides = [1, 1]} : vector<9x8xf32> to vector<1x8xf32>
    %90 = vector.shape_cast %89 : vector<1x8xf32> to vector<8xf32>
    %91 = vector.shape_cast %90 : vector<8xf32> to vector<1x8xf32>
    %92 = vector.broadcast %91 : vector<1x8xf32> to vector<128x8xf32>
    %93 = arith.mulf %88, %92 : vector<128x8xf32>
    %94 = arith.addf %87, %93 : vector<128x8xf32>
    %95 = vector.extract_strided_slice %38 {offsets = [32, 0], sizes = [128, 8], strides = [1, 1]} : vector<160x8xf32> to vector<128x8xf32>
    %96 = vector.extract_strided_slice %39 {offsets = [8, 0], sizes = [1, 8], strides = [1, 1]} : vector<9x8xf32> to vector<1x8xf32>
    %97 = vector.shape_cast %96 : vector<1x8xf32> to vector<8xf32>
    %98 = vector.shape_cast %97 : vector<8xf32> to vector<1x8xf32>
    %99 = vector.broadcast %98 : vector<1x8xf32> to vector<128x8xf32>
    %100 = arith.mulf %95, %99 : vector<128x8xf32>
    %101 = arith.addf %94, %100 : vector<128x8xf32>
    %c0_18 = arith.constant 0 : index
    %c0_19 = arith.constant 0 : index
    %102 = vector.load %arg4[%c0_18, %c0_19] : memref<1x8xf32, #tpu.memory_space<vmem>>, vector<1x8xf32>
    %103 = vector.broadcast %102 : vector<1x8xf32> to vector<128x8xf32>
    %104 = arith.addf %101, %103 : vector<128x8xf32>
    %cst_20 = arith.constant 0.000000e+00 : f32
    %105 = vector.broadcast %cst_20 : f32 to vector<128x8xf32>
    %106 = arith.maximumf %104, %105 : vector<128x8xf32>
    %c0_21 = arith.constant 0 : index
    %c0_22 = arith.constant 0 : index
    %107 = vector.load %arg5[%c0_21, %c0_22] : memref<8x128xf32, #tpu.memory_space<vmem>>, vector<8x128xf32>
    %cst_23 = arith.constant dense<0.000000e+00> : vector<128x128xf32>
    %108 = tpu.matmul %106, %107, %cst_23 {dimension_numbers = #tpu.dot_dimension_numbers<[1], [0], [0], [1], [0, 0, 1, 1], [], []>} : vector<128x8xf32>, vector<8x128xf32>, vector<128x128xf32> -> vector<128x128xf32>
    %c0_24 = arith.constant 0 : index
    %c0_25 = arith.constant 0 : index
    %109 = vector.load %arg6[%c0_24, %c0_25] : memref<1x128xf32, #tpu.memory_space<vmem>>, vector<1x128xf32>
    %110 = vector.broadcast %109 : vector<1x128xf32> to vector<128x128xf32>
    %111 = arith.addf %108, %110 : vector<128x128xf32>
    %cst_26 = arith.constant 0.000000e+00 : f32
    %112 = vector.broadcast %cst_26 : f32 to vector<128x128xf32>
    %113 = arith.maximumf %111, %112 : vector<128x128xf32>
    %c0_27 = arith.constant 0 : index
    %c0_28 = arith.constant 0 : index
    %114 = vector.load %arg7[%c0_27, %c0_28] : memref<128x128xf32, #tpu.memory_space<vmem>>, vector<128x128xf32>
    %cst_29 = arith.constant dense<0.000000e+00> : vector<128x128xf32>
    %115 = tpu.matmul %113, %114, %cst_29 {dimension_numbers = #tpu.dot_dimension_numbers<[1], [0], [0], [1], [0, 0, 1, 1], [], []>} : vector<128x128xf32>, vector<128x128xf32>, vector<128x128xf32> -> vector<128x128xf32>
    %c0_30 = arith.constant 0 : index
    %c0_31 = arith.constant 0 : index
    %116 = vector.load %arg8[%c0_30, %c0_31] : memref<1x128xf32, #tpu.memory_space<vmem>>, vector<1x128xf32>
    %117 = vector.broadcast %116 : vector<1x128xf32> to vector<128x128xf32>
    %118 = arith.addf %115, %117 : vector<128x128xf32>
    %119 = vector.shape_cast %118 : vector<128x128xf32> to vector<8x16x128xf32>
    %c0_32 = arith.constant 0 : index
    %c0_33 = arith.constant 0 : index
    %c0_34 = arith.constant 0 : index
    %c0_35 = arith.constant 0 : index
    %120 = vector.load %arg9[%c0_32, %c0_33, %c0_34, %c0_35] : memref<1x8x16x128xf32, #tpu.memory_space<vmem>>, vector<1x8x16x128xf32>
    %121 = vector.shape_cast %120 : vector<1x8x16x128xf32> to vector<8x16x128xf32>
    %122 = vector.shape_cast %119 : vector<8x16x128xf32> to vector<1x8x16x128xf32>
    tpu.vector_store %arg9[%c0_32, %c0_33, %c0_34, %c0_35], %122 {strides = array<i32>} : memref<1x8x16x128xf32, #tpu.memory_space<vmem>>, vector<1x8x16x128xf32>,
    return
  }
  func.func @transform_0(%arg0: i32, %arg1: i32) -> (i32, i32, i32) {
    %c0_i32 = arith.constant 0 : i32
    %c0_i32_0 = arith.constant 0 : i32
    %c0_i32_1 = arith.constant 0 : i32
    return %arg0, %c0_i32, %c0_i32_0 : i32, i32, i32
  }
  func.func @transform_1(%arg0: i32, %arg1: i32) -> (i32, i32) {
    %c0_i32 = arith.constant 0 : i32
    %c0_i32_0 = arith.constant 0 : i32
    %c0_i32_1 = arith.constant 0 : i32
    return %c0_i32, %c0_i32_0 : i32, i32
  }
  func.func @transform_2(%arg0: i32, %arg1: i32) -> (i32, i32) {
    %c0_i32 = arith.constant 0 : i32
    %c0_i32_0 = arith.constant 0 : i32
    %c0_i32_1 = arith.constant 0 : i32
    return %c0_i32, %c0_i32_0 : i32, i32
  }
  func.func @transform_3(%arg0: i32, %arg1: i32) -> (i32, i32) {
    %c0_i32 = arith.constant 0 : i32
    %c0_i32_0 = arith.constant 0 : i32
    %c0_i32_1 = arith.constant 0 : i32
    return %c0_i32, %c0_i32_0 : i32, i32
  }
  func.func @transform_4(%arg0: i32, %arg1: i32) -> (i32, i32) {
    %c0_i32 = arith.constant 0 : i32
    %c0_i32_0 = arith.constant 0 : i32
    %c0_i32_1 = arith.constant 0 : i32
    return %c0_i32, %c0_i32_0 : i32, i32
  }
  func.func @transform_5(%arg0: i32, %arg1: i32) -> (i32, i32) {
    %c0_i32 = arith.constant 0 : i32
    %c0_i32_0 = arith.constant 0 : i32
    %c0_i32_1 = arith.constant 0 : i32
    return %c0_i32, %c0_i32_0 : i32, i32
  }
  func.func @transform_6(%arg0: i32, %arg1: i32) -> (i32, i32) {
    %c0_i32 = arith.constant 0 : i32
    %c0_i32_0 = arith.constant 0 : i32
    %c0_i32_1 = arith.constant 0 : i32
    return %c0_i32, %c0_i32_0 : i32, i32
  }
  func.func @transform_7(%arg0: i32, %arg1: i32) -> (i32, i32, i32, i32) {
    %c0_i32 = arith.constant 0 : i32
    %c0_i32_0 = arith.constant 0 : i32
    %c0_i32_1 = arith.constant 0 : i32
    return %arg0, %arg1, %c0_i32, %c0_i32_0 : i32, i32, i32, i32
  }
}

</mosaic_0001>

<bundles_post_ra>
// kernel: tpu_custom_call.1
= control target key start
LH: loop header
LB: loop body
LE: loop exit
PB: predicated region body
PF: predicated region fallthrough
CT: control target
= control target key end

     0   :  { %12 = vsyncpa [#allocation4], 0  ;;  %s2344_s0 = inlined_call_operand.vmem [shape: f32[2,256,8], index: 0, kind: input, shape index: {}]   ;;  %s2345_s1 = inlined_call_operand.vmem [shape: f32[9,8], index: 1, kind: input, shape index: {}]   ;;  %s2346_s2 = inlined_call_operand.vmem [shape: f32[1,8], index: 2, kind: input, shape index: {}]   ;;  %s2347_s3 = inlined_call_operand.vmem [shape: f32[8,128], index: 3, kind: input, shape index: {}]   ;;  %s2348_s4 = inlined_call_operand.vmem [shape: f32[1,128], index: 4, kind: input, shape index: {}]   ;;  %s2349_s5 = inlined_call_operand.vmem [shape: f32[128,128], index: 5, kind: input, shape index: {}]   ;;  %s2350_s6 = inlined_call_operand.vmem [shape: f32[1,128], index: 6, kind: input, shape index: {}]   ;;  %s2351_s7 = inlined_call_operand.hbm [shape: f32[2,16,16,128], index: 7, kind: output, shape index: {}]  }
   0x1   :  { %14 = vsyncpa [#allocation4 + $0x1], 0  ;;  %s1519_s24 = smov 0   ;;  %s1521_s25 = smov 0  }
   0x2   :  { %s1523_s26 = smov 0   ;;  %s1525_s27 = smov 0  }
   0x3   :  { %s1527_s28 = smov 0   ;;  %s1529_s29 = smov 0  }
   0x4   :  { %s1531_s30 = smov 0   ;;  %s1533_s8 = smov 0  }
   0x5 LB: > { %s1224_s9 = sadd.s32 4294967295, %s1475_s8   ;;  %s1225_s10 = sadd.s32 4294967294, %s1475_s8   ;;  %s1475_s8 = sphi %s1533_s8, %s20_s8   ;;  %s1471_s30 = sphi %s1531_s30, %s2362_s30   ;;  %s1467_s29 = sphi %s1529_s29, %s2361_s29   ;;  %s1463_s28 = sphi %s1527_s28, %s2360_s28   ;;  %s1459_s27 = sphi %s1525_s27, %s2359_s27   ;;  %s1455_s26 = sphi %s1523_s26, %s2358_s26   ;;  %s1451_s25 = sphi %s1521_s25, %s2357_s25   ;;  %s1447_s24 = sphi %s1519_s24, %s2356_s24  }
   0x6   : > { %s29_s11 = sadd.s32 1, %s1467_s29  ;;  %s32_s12 = sadd.s32 1, %s1471_s30 }
   0x7   : > { %p30_p0 = scmp.ge.s32.totalorder %s29_s11, 2  ;;  %p203_p1 = scmp.ne.s32.totalorder %s1455_s26, %s1451_s25 }
   0x8   : > { %p204_p2 = scmp.eq.s32.totalorder %s1224_s9, 3  ;;  %p209_p5 = scmp.ne.s32.totalorder %s1451_s25, %s1447_s24 }
   0x9   : > { %s2364_s11 = smov (%p30_p0, %s29_s11), 0  ;;  %s2366_s12 = smov (!%p30_p0, %s32_s12), %s1471_s30 }
   0xa   : > { %s189_s13 = ssub.s32 %s1467_s29, %s2364_s11  ;;  %p1570_p3 = por %p204_p2, %p203_p1 }
   0xb   : > { %p34_p4 = scmp.ge.s32.totalorder %s2366_s12, 2  ;;  %p210_p6 = scmp.eq.s32.totalorder %s1225_s10, 3 }
   0xc   : > { %p1228_p7 = scmp.ge.s32.totalorder %s1475_s8, 1  ;;  %p254_p9 = scmp.lt.s32.totalorder %s1475_s8, 5 }
   0xd   : > { %s2368_s12 = smov (%p34_p4, %s2366_s12), 0  ;;  %p1579_p8 = por %p210_p6, %p209_p5 }
   0xe   : > { %s188_s16 = ssub.s32 %s1471_s30, %s2368_s12  ;;  %s193_s17 = sadd.s32 1, %s1455_s26 }
   0xf   : > { %s190_s18 = sor.u32 %s189_s13, %s188_s16  ;;  %p255_p10 = pnand %p1228_p7, %p254_p9 }
  0x10   : > { %p191_p11 = scmp.eq.s32.totalorder %s190_s18, 0  ;;  %p286_p12 = scmp.lt.s32.totalorder (!%p255_p10), %s1463_s28, 1 }
  0x11   : > { %258 = sbr.rel (%p255_p10) target bundleno = 432 (0x1b0), region = 48  ;;  %s1595_s22 = sshll.u32 (!%p255_p10), %s1459_s27, 7 }
  0x12   : > { %s1588_s19 = scalar_select %p191_p11, %s1455_s26, %s193_s17  }
  0x13   : > { %s1233_s23 = sadd.s32 (!%p255_p10), 4294967280, %s1595_s22  ;;  %p299_p0 = scmp.gt.s32.totalorder (!%p255_p10), %s1459_s27, 0 }
  0x14   : > { %p294_p13 = scmp.gt.s32.totalorder (!%p255_p10), %s1233_s23, 0 }
  0x16   : > { %v890_v0 = vld [vmem:[%s2347_s3] sm:$0xff]  ;;  %s287_s9 = scalar_select %p286_p12, %s1463_s28, 1  ;;  %vm305_vm0 = vcmask 64512   ;;  %v378_v4 = vlaneseq  ;;  %vm404_vm1 = vcmask 1040384   ;;  %vm489_vm2 = vcmask 1046528  }
  0x17   : > { %958 = vmatpush.msra.mxu0 %v890_v0  ;;  %1259 = vmatpush.msra.mxu3 %v890_v0  ;;  %s2370_s23 = smov (!%p294_p13, %s1233_s23), 0  ;;  %v356_v6 = vld [vmem:[#allocation2] sm:$0xff] }
  0x18   : > { %s1257_s10 = sshll.u32 %s287_s9, 8  ;;  %v1618_v8 = vshrl.u32 %v378_v4, 7  ;;  %v571_v9 = vld [vmem:[%s2345_s1] sm:$0xff]  ;;  %v405_v15 = vrot.slane %v356_v6, 7 }
  0x19   : > { %s1603_s17 = scalar_lea.vmem %s2344_s0, %s1257_s10  ;;  %v1627_v13 = vperm.slane %v571_v9, 4  ;;  %v1632_v16 = vperm.slane %v571_v9, 0  ;;  %v1637_v18 = vperm.slane %v571_v9, 1  ;;  %v1639_v19 = vperm.slane %v571_v9, 2  ;;  %s341_s10 = sadd.s32 128, %s1595_s22 }
  0x1a   : > { %s1607_s18 = scalar_lea.vmem %s1603_s17, %s1595_s22  ;;  %s296_s20 = scalar_lea.vmem %s1603_s17, %s2370_s23  ;;  %v1630_v14 = vadd.s32 8, %v1618_v8  ;;  %v1641_v20 = vperm.slane %v571_v9, 3  ;;  %v1643_v21 = vperm.slane %v571_v9, 7  ;;  %vm381_vm3 = vcmp.gt.s32.totalorder %v1618_v8, 0 }
  0x1b   : > { %v309_v1 = vld [vmem:[%s1607_s18] sm:$0xff]  ;;  %v310_v2 = vld [vmem:[%s1607_s18 + $0x8] sm:$0xff]  ;;  %v311_v3 = vld [vmem:[%s1607_s18 + $0x10] sm:$0xff]  ;;  %s1366_s21 = scalar_select %p299_p0, 255, 0  ;;  %v1650_v24 = vperm.slane %v571_v9, 5 }
  0x1c   : > { %v312_v5 = vld [vmem:[%s1607_s18 + $0x18] sm:$0xff]  ;;  %325 = vst.msk [vmem:[#allocation2 + $0x18] sm:$0xff] %vm305_vm0, %v309_v1  ;;  %v313_v10 = vld [vmem:[%s1607_s18 + $0x20] sm:$0xff]  ;;  %v314_v12 = vld [vmem:[%s1607_s18 + $0x28] sm:$0xff]  ;;  %v1652_v25 = vperm.slane %v571_v9, 6  ;;  %vm487_vm4 = vcmp.lt.s32.totalorder %v1630_v14, 15 }
  0x1d   : > { %326 = vst.msk [vmem:[#allocation2 + $0x20] sm:$0xff] %vm305_vm0, %v310_v2  ;;  %v1367_v7 = vld [vmem:[%s296_s20] sm:%s1366_s21]  ;;  %v1370_v11 = vld [vmem:[%s296_s20 + $0x8] sm:%s1366_s21]  ;;  %s347_s21 = sadd.s32 1, %s1459_s27  ;;  %p1896_p2 = scmp.lt.s32.totalorder %s341_s10, 240 }
  0x1e   : > { %327 = vst.msk [vmem:[#allocation2 + $0x28] sm:$0xff] %vm305_vm0, %v311_v3  ;;  %v315_v31 = vld [vmem:[%s1607_s18 + $0x30] sm:$0xff]  ;;  %v316_v9 = vld [vmem:[%s1607_s18 + $0x38] sm:$0xff]  ;;  %p1869_p1 = scmp.lt.s32.totalorder %s347_s21, 2  ;;  %s283_s21 = sand.u32 1, %s1451_s25  }
  0x1f   : > { %328 = vst.msk [vmem:[#allocation2 + $0x30] sm:$0xff] %vm305_vm0, %v312_v5  ;;  %s2372_s10 = smov (!%p1896_p2, %s341_s10), 240  ;;  %v1030_v14 = vld [vmem:[%s2349_s5 + $0x30] sm:$0xff]  ;;  %s1229_s9 = sshll.u32 %s283_s21, 7 }
  0x20   : > { %306 = vst.msk [vmem:[#allocation2 + $0x8] sm:$0xff] %vm305_vm0, %v1367_v7  ;;  %s1954_s22 = scalar_select %p1869_p1, 255, 0 }
  0x21   : > { %307 = vst.msk [vmem:[#allocation2 + $0x10] sm:$0xff] %vm305_vm0, %v1370_v11  ;;  %s1401_s20 = scalar_lea.hbm %s2351_s7, 512 }
  0x22   : > { %329 = vst.msk [vmem:[#allocation2 + $0x38] sm:$0xff] %vm305_vm0, %v313_v10 }
  0x23   : > { %v1635_v17 = vld [vmem:[#allocation2 + $0x18] sm:$0xff]  ;;  %330 = vst.msk [vmem:[#allocation2 + $0x40] sm:$0xff] %vm305_vm0, %v314_v12 }
  0x24   : > { %v1646_v22 = vld [vmem:[#allocation2 + $0x20] sm:$0xff]  ;;  %v493_v23 = vrot.slane %v1635_v17, 1  ;;  %v410_v27 = vrot.slane %v1635_v17, 7  ;;  %v1661_v30 = vmul.f32 %v1627_v13, %v1635_v17  ;;  %v1675_v36 = vmul.f32 %v1637_v18, %v1635_v17  ;;  %331 = vst.msk [vmem:[#allocation2 + $0x48] sm:$0xff] %vm305_vm0, %v315_v31 }
  0x25   : > { %v1654_v26 = vld [vmem:[#allocation2 + $0x28] sm:$0xff]  ;;  %v412_v28 = vrot.slane %v1646_v22, 7  ;;  %v495_v29 = vrot.slane %v1646_v22, 1  ;;  %v1671_v35 = vmul.f32 %v1627_v13, %v1646_v22  ;;  %v1687_v41 = vmul.f32 %v1637_v18, %v1646_v22  ;;  %332 = vst.msk [vmem:[#allocation2 + $0x50] sm:$0xff] %vm305_vm0, %v316_v9 }
  0x26   : > { %v1665_v32 = vld [vmem:[#allocation2 + $0x30] sm:$0xff]  ;;  %v414_v33 = vrot.slane %v1654_v26, 7  ;;  %v497_v34 = vrot.slane %v1654_v26, 1  ;;  %v595_v39 = vmul.f32 %v1637_v18, %v1654_v26  ;;  %v1683_v40 = vmul.f32 %v1643_v21, %v1654_v26  ;;  %v1734_v22 = vld [vmem:[%s2345_s1 + $0x8] ss:$0 sm:$0xff] }
  0x27   : > { %v357_v37 = vld [vmem:[#allocation2 + $0x8] sm:$0xff]  ;;  %v499_v38 = vrot.slane %v1665_v32, 1  ;;  %v496_v46 = vsel %vm489_vm2, %v493_v23, %v495_v29  ;;  %v416_v50 = vrot.slane %v1665_v32, 7  ;;  %v413_v3 = vsel %vm404_vm1, %v410_v27, %v412_v28 }
  0x28   : > { %v358_v42 = vld [vmem:[#allocation2 + $0x10] sm:$0xff]  ;;  %v406_v43 = vrot.slane %v357_v37, 7  ;;  %v415_v44 = vsel %vm404_vm1, %v412_v28, %v414_v33  ;;  %v490_v45 = vrot.slane %v357_v37, 1  ;;  %v591_v54 = vmul.f32 %v1637_v18, %v357_v37 }
  0x29   : > { %v408_v47 = vrot.slane %v358_v42, 7  ;;  %v470_v48 = vsel %vm381_vm3, %v415_v44, 0.0  ;;  %v491_v49 = vrot.slane %v358_v42, 1  ;;  %v500_v52 = vsel %vm489_vm2, %v497_v34, %v499_v38  ;;  %v1714_v2 = vld [vmem:[#allocation2 + $0x38] sm:$0xff] }
  0x2a   : > { %v407_v51 = vsel %vm404_vm1, %v405_v15, %v406_v43  ;;  %v578_v53 = vmul.f32 %v1632_v16, %v470_v48  ;;  %v628_v58 = vmul.f32 %v1639_v19, %v500_v52  ;;  %v1709_v0 = vmul.f32 %v1639_v19, %v496_v46 }
  0x2b   : > { %v411_v55 = vsel %vm404_vm1, %v408_v47, %v410_v27  ;;  %v466_v56 = vsel %vm381_vm3, %v407_v51, 0.0  ;;  %v492_v57 = vsel %vm489_vm2, %v490_v45, %v491_v49  ;;  %v1712_v1 = vmul.f32 %v1641_v20, %v470_v48 }
  0x2c   : > { %v468_v59 = vsel %vm381_vm3, %v411_v55, 0.0  ;;  %v574_v60 = vmul.f32 %v1632_v16, %v466_v56  ;;  %v611_v61 = vadd.f32 %v595_v39, %v578_v53  ;;  %v624_v62 = vmul.f32 %v1639_v19, %v492_v57  ;;  %v318_v55 = vld [vmem:[%s1607_s18 + $0x48] sm:$0xff] }
  0x2d   : > { %v576_v63 = vmul.f32 %v1632_v16, %v468_v59  ;;  %v657_v5 = vmul.f32 %v1641_v20, %v468_v59  ;;  %v723_v6 = vmul.f32 %v1650_v24, %v496_v46  ;;  %v1720_v7 = vmul.f32 %v1650_v24, %v500_v52  ;;  %334 = vst.msk [vmem:[#allocation2 + $0x60] sm:$0xff] %vm305_vm0, %v318_v55 }
  0x2e   : > { %v607_v4 = vadd.f32 %v591_v54, %v574_v60  ;;  %v1723_v10 = vadd.f32 %v628_v58, %v611_v61  ;;  %v409_v11 = vsel %vm404_vm1, %v406_v43, %v408_v47  ;;  %v417_v12 = vsel %vm404_vm1, %v414_v33, %v416_v50  ;;  %v317_v43 = vld [vmem:[%s1607_s18 + $0x40] sm:$0xff]  ;;  %v319_v60 = vld [vmem:[%s1607_s18 + $0x50] sm:$0xff] }
  0x2f   : > { %v494_v15 = vsel %vm489_vm2, %v491_v49, %v493_v23  ;;  %v498_v27 = vsel %vm489_vm2, %v495_v29, %v497_v34  ;;  %v501_v28 = vrot.slane %v1714_v2, 1  ;;  %v756_v37 = vmul.f32 %v1652_v25, %v470_v48  ;;  %333 = vst.msk [vmem:[#allocation2 + $0x58] sm:$0xff] %vm305_vm0, %v317_v43  ;;  %v1758_v54 = vld [vmem:[#allocation2 + $0x40] sm:$0xff] }
  0x30   : > { %v640_v17 = vadd.f32 %v624_v62, %v607_v4  ;;  %v552_v31 = vsel %vm487_vm4, %v494_v15, 0.0  ;;  %v575_v33 = vmul.f32 %v1632_v16, %v409_v11  ;;  %v579_v23 = vmul.f32 %v1632_v16, %v417_v12  ;;  %335 = vst.msk [vmem:[#allocation2 + $0x68] sm:$0xff] %vm305_vm0, %v319_v60 }
  0x31   : > { %v592_v39 = vmul.f32 %v1637_v18, %v358_v42  ;;  %v502_v45 = vsel %vm489_vm2, %v499_v38, %v501_v28  ;;  %v596_v29 = vmul.f32 %v1637_v18, %v1665_v32  ;;  %v625_v34 = vmul.f32 %v1639_v19, %v552_v31 }
  0x32   : > { %v673_v44 = vadd.f32 %v657_v5, %v640_v17  ;;  %v554_v46 = vsel %vm487_vm4, %v498_v27, 0.0  ;;  %v556_v47 = vsel %vm487_vm4, %v502_v45, 0.0  ;;  %v658_v48 = vmul.f32 %v1641_v20, %v413_v3 }
  0x33   : > { %v608_v42 = vadd.f32 %v592_v39, %v575_v33  ;;  %v822_v38 = vmul.f32 %v1734_v22, %v500_v52  ;;  %v612_v51 = vadd.f32 %v596_v29, %v579_v23  ;;  %v629_v53 = vmul.f32 %v1639_v19, %v556_v47  ;;  %v1793_v23 = vld [vmem:[%s2346_s2] ss:$0 sm:$0xff]  ;;  %v320_v39 = vld [vmem:[%s1607_s18 + $0x58] sm:$0xff] }
  0x34   : > { %v706_v49 = vadd.f32 %v1661_v30, %v673_v44  ;;  %v577_v56 = vmul.f32 %v1632_v16, %v413_v3  ;;  %v627_v57 = vmul.f32 %v1639_v19, %v554_v46  ;;  %v1764_v59 = vmul.f32 %v1641_v20, %v417_v12  ;;  %v321_v29 = vld [vmem:[%s1607_s18 + $0x60] sm:$0xff]  ;;  %336 = vst.msk [vmem:[#allocation2 + $0x70] sm:$0xff] %vm305_vm0, %v320_v39 }
  0x35   : > { %v641_v58 = vadd.f32 %v625_v34, %v608_v42  ;;  %v724_v52 = vmul.f32 %v1650_v24, %v554_v46  ;;  %v1770_v61 = vmul.f32 %v1650_v24, %v556_v47  ;;  %v757_v62 = vmul.f32 %v1652_v25, %v417_v12  ;;  %337 = vst.msk [vmem:[#allocation2 + $0x78] sm:$0xff] %vm305_vm0, %v321_v29 }
  0x36   : > { %v739_v30 = vadd.f32 %v723_v6, %v706_v49  ;;  %v1774_v3 = vadd.f32 %v629_v53, %v612_v51  ;;  %v418_v5 = vrot.slane %v1714_v2, 7  ;;  %v503_v9 = vrot.slane %v1758_v54, 1 }
  0x37   : > { %v674_v4 = vadd.f32 %v658_v48, %v641_v58  ;;  %v790_v6 = vmul.f32 %v1643_v21, %v1665_v32  ;;  %v823_v15 = vmul.f32 %v1734_v22, %v556_v47  ;;  %v609_v17 = vadd.f32 %v1675_v36, %v576_v63  ;;  %v1800_v63 = vld [vmem:[#allocation2 + $0x48] sm:$0xff] }
  0x38   : > { %v772_v11 = vadd.f32 %v756_v37, %v739_v30  ;;  %v419_v27 = vsel %vm404_vm1, %v416_v50, %v418_v5  ;;  %v597_v31 = vmul.f32 %v1637_v18, %v1714_v2  ;;  %v420_v33 = vrot.slane %v1758_v54, 7 }
  0x39   : > { %v707_v12 = vadd.f32 %v1671_v35, %v674_v4  ;;  %v472_v36 = vsel %vm381_vm3, %v419_v27, 0.0  ;;  %v642_v35 = vadd.f32 %v1709_v0, %v609_v17  ;;  %v692_v50 = vmul.f32 %v1627_v13, %v1654_v26  ;;  %v1828_v27 = vld [vmem:[#allocation2 + $0x50] sm:$0xff] }
  0x3a   : > { %v805_v37 = vadd.f32 %v1683_v40, %v772_v11  ;;  %v504_v44 = vsel %vm489_vm2, %v501_v28, %v503_v9  ;;  %v580_v40 = vmul.f32 %v1632_v16, %v472_v36  ;;  %v791_v45 = vmul.f32 %v1643_v21, %v1714_v2 }
  0x3b   : > { %v740_v43 = vadd.f32 %v724_v52, %v707_v12  ;;  %v630_v0 = vmul.f32 %v1639_v19, %v504_v44  ;;  %v675_v46 = vadd.f32 %v1712_v1, %v642_v35  ;;  %v758_v26 = vmul.f32 %v1652_v25, %v472_v36 }
  0x3c   : > { %v838_v34 = vadd.f32 %v822_v38, %v805_v37  ;;  %v613_v28 = vadd.f32 %v597_v31, %v580_v40  ;;  %v421_v42 = vsel %vm404_vm1, %v418_v5, %v420_v33  ;;  %v505_v48 = vrot.slane %v1800_v63, 1  ;;  %v322_v5 = vld [vmem:[%s1607_s18 + $0x68] sm:$0xff] }
  0x3d   : > { %v773_v47 = vadd.f32 %v757_v62, %v740_v43  ;;  %v708_v51 = vadd.f32 %v692_v50, %v675_v46  ;;  %v581_v38 = vmul.f32 %v1632_v16, %v421_v42  ;;  %v598_v53 = vmul.f32 %v1637_v18, %v1758_v54  ;;  %338 = vst.msk [vmem:[#allocation2 + $0x80] sm:$0xff] %vm305_vm0, %v322_v5 }
  0x3e   : > { %v858_v49 = vadd.f32 %v1793_v23, %v838_v34  ;;  %v661_v55 = vmul.f32 %v1641_v20, %v472_v36  ;;  %v506_v58 = vsel %vm489_vm2, %v503_v9, %v505_v48  ;;  %v610_v60 = vadd.f32 %v1687_v41, %v577_v56 }
  0x3f   : > { %v806_v1 = vadd.f32 %v790_v6, %v773_v47  ;;  %v727_v52 = vmul.f32 %v1650_v24, %v504_v44  ;;  %v741_v62 = vadd.f32 %v1720_v7, %v708_v51  ;;  %v558_v4 = vsel %vm487_vm4, %v506_v58, 0.0  ;;  %v323_v47 = vld [vmem:[%s1607_s18 + $0x70] sm:$0xff] }
  0x40   : > { %v874_v30 = vmax.f32 %v858_v49, 0.0  ;;  %v614_v17 = vadd.f32 %v598_v53, %v581_v38  ;;  %v631_v12 = vmul.f32 %v1639_v19, %v558_v4  ;;  %v643_v6 = vadd.f32 %v627_v57, %v610_v60  ;;  %339 = vst.msk [vmem:[#allocation2 + $0x88] sm:$0xff] %vm305_vm0, %v323_v47 }
  0x41   : > { %v839_v11 = vadd.f32 %v823_v15, %v806_v1  ;;  %v1832_v41 = vadd.f32 %v630_v0, %v613_v28  ;;  %v774_v56 = vadd.f32 %v758_v26, %v741_v62  ;;  %v824_v7 = vmul.f32 %v1734_v22, %v504_v44 }
  0x42   : > { %1234 = vmatmul.msk.f32.vlgmr.msra.gmra.mxu0 %vm305_vm0, %v874_v30  ;;  %v693_v9 = vmul.f32 %v1627_v13, %v1665_v32  ;;  %v662_v31 = vmul.f32 %v1641_v20, %v421_v42  ;;  %v676_v57 = vadd.f32 %v1764_v59, %v643_v6  ;;  %v728_v37 = vmul.f32 %v1650_v24, %v558_v4 }
  0x43   : > { %v859_v15 = vadd.f32 %v1793_v23, %v839_v11  ;;  %v807_v36 = vadd.f32 %v791_v45, %v774_v56  ;;  %v759_v35 = vmul.f32 %v1652_v25, %v421_v42  ;;  %v422_v50 = vrot.slane %v1800_v63, 7 }
  0x44   : > { %v507_v39 = vrot.slane %v1828_v27, 1  ;;  %v1844_v44 = vadd.f32 %v631_v12, %v614_v17  ;;  %v709_v32 = vadd.f32 %v693_v9, %v676_v57  ;;  %v677_v40 = vadd.f32 %v661_v55, %v1723_v10  ;;  %v1876_v55 = vld [vmem:[#allocation2 + $0x58] sm:$0xff]  ;;  %v1892_v57 = vld [vmem:[#allocation2 + $0x60] sm:$0xff] }
  0x45   : > { %v875_v43 = vmax.f32 %v859_v15, 0.0  ;;  %v840_v29 = vadd.f32 %v824_v7, %v807_v36  ;;  %v423_v34 = vsel %vm404_vm1, %v420_v33, %v422_v50  ;;  %v599_v59 = vmul.f32 %v1637_v18, %v1800_v63 }
  0x46   : > { %v694_v45 = vmul.f32 %v1627_v13, %v1714_v2  ;;  %v742_v0 = vadd.f32 %v1770_v61, %v709_v32  ;;  %v792_v46 = vmul.f32 %v1643_v21, %v1758_v54  ;;  %v474_v26 = vsel %vm381_vm3, %v423_v34, 0.0 }
  0x47   : > { %v508_v10 = vsel %vm489_vm2, %v505_v48, %v507_v39  ;;  %v825_v33 = vmul.f32 %v1734_v22, %v558_v4  ;;  %v582_v28 = vmul.f32 %v1632_v16, %v474_v26  ;;  %v860_v2 = vadd.f32 %v1793_v23, %v840_v29  ;;  %v324_v29 = vld [vmem:[%s1607_s18 + $0x78] sm:$0xff]  ;;  %s1960_s18 = scalar_lea.vmem %s1603_s17, %s2372_s10  ;;  %s1253_s17 = sshll.u32 %s1463_s28, 5 }
  0x48   : > { %v632_v42 = vmul.f32 %v1639_v19, %v508_v10  ;;  %v710_v49 = vadd.f32 %v694_v45, %v677_v40  ;;  %v775_v61 = vadd.f32 %v759_v35, %v742_v0  ;;  %v1866_v51 = vmul.f32 %v1650_v24, %v508_v10  ;;  %340 = vst.msk [vmem:[#allocation2 + $0x90] sm:$0xff] %vm305_vm0, %v324_v29  ;;  %s1126_s28 = scalar_lea.sflag [#allocation4], %s283_s21 }
  0x49   : > { %v760_v38 = vmul.f32 %v1652_v25, %v474_v26  ;;  %v615_v48 = vadd.f32 %v599_v59, %v582_v28  ;;  %v793_v1 = vmul.f32 %v1643_v21, %v1800_v63  ;;  %v424_v58 = vrot.slane %v1828_v27, 7 }
  0x4a   : > { %1235 = vmatmul.msk.f32.gmra.mxu0 %vm305_vm0, %v875_v43  ;;  %v743_v53 = vadd.f32 %v727_v52, %v710_v49  ;;  %v808_v60 = vadd.f32 %v792_v46, %v775_v61  ;;  %v509_v30 = vrot.slane %v1876_v55, 1  ;;  %v600_v62 = vmul.f32 %v1637_v18, %v1828_v27 }
  0x4b   : > { %v678_v4 = vadd.f32 %v662_v31, %v1774_v3  ;;  %v826_v52 = vmul.f32 %v1734_v22, %v508_v10  ;;  %v425_v11 = vsel %vm404_vm1, %v422_v50, %v424_v58  ;;  %v695_v17 = vmul.f32 %v1627_v13, %v1758_v54 }
  0x4c   : > { %v776_v5 = vadd.f32 %v760_v38, %v743_v53  ;;  %v841_v12 = vadd.f32 %v825_v33, %v808_v60  ;;  %v663_v6 = vmul.f32 %v1641_v20, %v474_v26  ;;  %v510_v56 = vsel %vm489_vm2, %v507_v39, %v509_v30  ;;  %v1942_v38 = vld [vmem:[#allocation2 + $0x68] sm:$0xff]  ;;  %v1950_v60 = vld [vmem:[#allocation2 + $0x78] sm:$0xff] }
  0x4d   : > { %v583_v7 = vmul.f32 %v1632_v16, %v425_v11  ;;  %v876_v9 = vmax.f32 %v860_v2, 0.0  ;;  %v711_v3 = vadd.f32 %v695_v17, %v678_v4  ;;  %v761_v31 = vmul.f32 %v1652_v25, %v425_v11 }
  0x4e   : > { %v809_v15 = vadd.f32 %v793_v1, %v776_v5  ;;  %v861_v54 = vadd.f32 %v1793_v23, %v841_v12  ;;  %v1901_v36 = vadd.f32 %v632_v42, %v615_v48  ;;  %v560_v35 = vsel %vm487_vm4, %v510_v56, 0.0  ;;  %v1944_v48 = vld [vmem:[#allocation2 + $0x70] sm:$0xff]  ;;  %v1966_v56 = vld [vmem:[#allocation2 + $0x80] sm:$0xff] }
  0x4f   : > { %v616_v50 = vadd.f32 %v600_v62, %v583_v7  ;;  %v633_v43 = vmul.f32 %v1639_v19, %v560_v35  ;;  %v744_v32 = vadd.f32 %v728_v37, %v711_v3  ;;  %v794_v40 = vmul.f32 %v1643_v21, %v1828_v27 }
  0x50   : > { %v842_v39 = vadd.f32 %v826_v52, %v809_v15  ;;  %v1910_v34 = vmul.f32 %v1641_v20, %v425_v11  ;;  %v1913_v59 = vmul.f32 %v1650_v24, %v560_v35  ;;  %v426_v45 = vrot.slane %v1876_v55, 7 }
  0x51   : > { %v511_v0 = vrot.slane %v1892_v57, 1  ;;  %v777_v46 = vadd.f32 %v761_v31, %v744_v32  ;;  %v827_v26 = vmul.f32 %v1734_v22, %v560_v35  ;;  %v679_v10 = vadd.f32 %v663_v6, %v1832_v41  ;;  %v1375_v35 = vld [vmem:[%s1960_s18] sm:%s1954_s22] }
  0x52   : > { %1236 = vmatmul.msk.f32.gmra.mxu0 %vm305_vm0, %v876_v9  ;;  %v1920_v37 = vadd.f32 %v1793_v23, %v842_v39  ;;  %v427_v47 = vsel %vm404_vm1, %v424_v58, %v426_v45  ;;  %v601_v28 = vmul.f32 %v1637_v18, %v1876_v55  ;;  %v696_v42 = vmul.f32 %v1627_v13, %v1800_v63 }
  0x53   : > { %v512_v33 = vsel %vm489_vm2, %v509_v30, %v511_v0  ;;  %v877_v49 = vmax.f32 %v861_v54, 0.0  ;;  %v1938_v41 = vadd.f32 %v633_v43, %v616_v50  ;;  %v810_v2 = vadd.f32 %v794_v40, %v777_v46  ;;  %354 = vst.msk [vmem:[#allocation2 + $0x98] sm:$0xff] %vm305_vm0, %v1375_v35 }
  0x54   : > { %v476_v61 = vsel %vm381_vm3, %v427_v47, 0.0  ;;  %v634_v1 = vmul.f32 %v1639_v19, %v512_v33  ;;  %v712_v58 = vadd.f32 %v696_v42, %v679_v10  ;;  %v795_v63 = vmul.f32 %v1643_v21, %v1876_v55 }
  0x55   : > { %v584_v53 = vmul.f32 %v1632_v16, %v476_v61  ;;  %v878_v30 = vmax.f32 %v1920_v37, 0.0  ;;  %v843_v62 = vadd.f32 %v827_v26, %v810_v2  ;;  %v762_v4 = vmul.f32 %v1652_v25, %v476_v61 }
  0x56   : > { %v428_v5 = vrot.slane %v1892_v57, 7  ;;  %v745_v11 = vadd.f32 %v1866_v51, %v712_v58  ;;  %v430_v17 = vrot.slane %v1942_v38, 7  ;;  %v432_v12 = vrot.slane %v1944_v48, 7 }
  0x57   : > { %v617_v52 = vadd.f32 %v601_v28, %v584_v53  ;;  %v828_v6 = vmul.f32 %v1734_v22, %v512_v33  ;;  %v434_v7 = vrot.slane %v1950_v60, 7  ;;  %v513_v9 = vrot.slane %v1942_v38, 1 }
  0x58   : > { %v515_v15 = vrot.slane %v1944_v48, 1  ;;  %v1972_v3 = vadd.f32 %v1793_v23, %v843_v62  ;;  %v778_v54 = vadd.f32 %v762_v4, %v745_v11  ;;  %v431_v51 = vsel %vm404_vm1, %v428_v5, %v430_v17 }
  0x59   : > { %v650_v31 = vadd.f32 %v634_v1, %v617_v52  ;;  %v435_v50 = vsel %vm404_vm1, %v432_v12, %v434_v7  ;;  %v1983_v39 = vsel %vm381_vm3, %v431_v51, 0.0  ;;  %v517_v32 = vrot.slane %v1950_v60, 1 }
  0x5a   : > { %1237 = vmatmul.msk.f32.gmra.mxu0 %vm305_vm0, %v877_v49  ;;  %v1986_v43 = vsel %vm489_vm2, %v513_v9, %v515_v15  ;;  %v811_v40 = vadd.f32 %v795_v63, %v778_v54  ;;  %v480_v29 = vsel %vm381_vm3, %v435_v50, 0.0  ;;  %v519_v37 = vrot.slane %v1966_v56, 1 }
  0x5b   : > { %v605_v46 = vmul.f32 %v1637_v18, %v1950_v60  ;;  %v1996_v26 = vmul.f32 %v1641_v20, %v476_v61  ;;  %v1999_v10 = vmul.f32 %v1650_v24, %v512_v33  ;;  %v588_v47 = vmul.f32 %v1632_v16, %v480_v29 }
  0x5c   : > { %v667_v28 = vmul.f32 %v1641_v20, %v1983_v39  ;;  %v879_v42 = vmax.f32 %v1972_v3, 0.0  ;;  %v844_v49 = vadd.f32 %v828_v6, %v811_v40  ;;  %v2007_v2 = vmul.f32 %v1639_v19, %v1986_v43 }
  0x5d   : > { %v700_v53 = vmul.f32 %v1627_v13, %v1942_v38  ;;  %v520_v61 = vsel %vm489_vm2, %v517_v32, %v519_v37  ;;  %v2013_v33 = vmul.f32 %v1641_v20, %v480_v29  ;;  %v733_v58 = vmul.f32 %v1650_v24, %v1986_v43 }
  0x5e   : > { %v683_v1 = vadd.f32 %v667_v28, %v650_v31  ;;  %v2018_v63 = vadd.f32 %v1793_v23, %v844_v49  ;;  %v621_v62 = vadd.f32 %v605_v46, %v588_v47  ;;  %v638_v4 = vmul.f32 %v1639_v19, %v520_v61  ;;  %v2048_v28 = vld [vmem:[#allocation2 + $0x88] sm:$0xff] }
  0x5f   : > { %v2022_v52 = vmul.f32 %v1650_v24, %v520_v61  ;;  %v766_v6 = vmul.f32 %v1652_v25, %v480_v29  ;;  %v429_v3 = vsel %vm404_vm1, %v426_v45, %v428_v5  ;;  %v514_v31 = vsel %vm489_vm2, %v511_v0, %v513_v9  ;;  %v1378_v49 = vld [vmem:[%s1960_s18 + $0x8] sm:%s1954_s22]  ;;  %s2280_s22 = scalar_lea.vmem [#allocation3], %s1229_s9  ;;  %s1258_s18 = sshll.u32 %s1459_s27, 4 }
  0x60   : > { %v716_v11 = vadd.f32 %v700_v53, %v683_v1  ;;  %v799_v54 = vmul.f32 %v1643_v21, %v1950_v60  ;;  %v562_v51 = vsel %vm487_vm4, %v514_v31, 0.0  ;;  %v585_v35 = vmul.f32 %v1632_v16, %v429_v3  ;;  %355 = vst.msk [vmem:[#allocation2 + $0xa0] sm:$0xff] %vm305_vm0, %v1378_v49  ;;  %s1138_s13 = sadd.s32 %s1258_s18, %s1253_s17  ;;  %s1141_s27 = sshll.u32 %s2280_s22, 4  ;;  %s1142_s27 = int_to_ptr.vmem [resolvable:$true] %s1141_s27 }
  0x61   : > { %v602_v50 = vmul.f32 %v1637_v18, %v1892_v57  ;;  %v832_v5 = vmul.f32 %v1734_v22, %v520_v61  ;;  %v635_v40 = vmul.f32 %v1639_v19, %v562_v51  ;;  %v680_v0 = vadd.f32 %v1910_v34, %v1844_v44  ;;  %s1254_s16 = sshll.u32 %s1138_s13, 3 }
  0x62   : > { %1238 = vmatmul.msk.f32.gmra.mxu0 %vm305_vm0, %v878_v30  ;;  %v749_v45 = vadd.f32 %v733_v58, %v716_v11  ;;  %v880_v9 = vmax.f32 %v2018_v63, 0.0  ;;  %v2044_v29 = vadd.f32 %v638_v4, %v621_v62  ;;  %v697_v47 = vmul.f32 %v1627_v13, %v1828_v27  ;;  %s1140_s10 = scalar_lea.hbm %s2351_s7, %s1254_s16 }
  0x63   : > { %v618_v46 = vadd.f32 %v602_v50, %v585_v35  ;;  %v2053_v53 = vmul.f32 %v1641_v20, %v429_v3  ;;  %v763_v61 = vmul.f32 %v1652_v25, %v429_v3  ;;  %v2057_v1 = vsel %vm404_vm1, %v430_v17, %v432_v12  ;;  %s1143_s23 = sshll.u32 %s1140_s10, 4  ;;  %s1144_s23 = int_to_ptr.hbm [resolvable:$true] %s1143_s23 }
  0x64   : > { %v782_v30 = vadd.f32 %v766_v6, %v749_v45  ;;  %v713_v34 = vadd.f32 %v697_v47, %v680_v0  ;;  %v436_v58 = vrot.slane %v1966_v56, 7  ;;  %v518_v27 = vsel %vm489_vm2, %v515_v15, %v517_v32  ;;  %s1395_s18 = sshra.s32 %s1144_s23, 4  ;;  %s1396_s18 = int_to_ptr.hbm [resolvable:$true] %s1395_s18 }
  0x65   : > { %v651_v44 = vadd.f32 %v635_v40, %v618_v46  ;;  %v2063_v4 = vmul.f32 %v1650_v24, %v562_v51  ;;  %v796_v11 = vmul.f32 %v1643_v21, %v1892_v57  ;;  %v521_v6 = vrot.slane %v2048_v28, 1  ;;  %s1397_s17 = scalar_lea.hbm %s1396_s18, 128  ;;  %p1402_p7 = scmp.lt.s32.totalorder %s1396_s18, %s2351_s7 }
  0x66   : > { %v815_v62 = vadd.f32 %v799_v54, %v782_v30  ;;  %v746_v17 = vadd.f32 %v1913_v59, %v713_v34  ;;  %v437_v12 = vsel %vm404_vm1, %v434_v7, %v436_v58  ;;  %v2074_v3 = vsel %vm487_vm4, %v518_v27, 0.0  ;;  %v2102_v34 = vld [vmem:[#allocation2 + $0x90] sm:$0xff]  ;;  %p1398_p4 = scmp.ne.s32.totalorder %s1396_s18, %s1397_s17  ;;  %p1403_p9 = scmp.lt.s32.totalorder %s1401_s20, %s1397_s17 }
  0x67   : > { %v668_v15 = vmul.f32 %v1641_v20, %v2057_v1  ;;  %v522_v31 = vsel %vm489_vm2, %v519_v37, %v521_v6  ;;  %v589_v54 = vmul.f32 %v1632_v16, %v437_v12  ;;  %v606_v35 = vmul.f32 %v1637_v18, %v1966_v56 }
  0x68   : > { %v848_v32 = vadd.f32 %v832_v5, %v815_v62  ;;  %v779_v59 = vadd.f32 %v763_v61, %v746_v17  ;;  %v829_v50 = vmul.f32 %v1734_v22, %v562_v51  ;;  %v701_v7 = vmul.f32 %v1627_v13, %v1944_v48  ;;  %p1399_p5 = pnand %p1398_p4, %p1570_p3  ;;  %p1404_p10 = por %p1403_p9, %p1402_p7 }
  0x69   : > { %v684_v45 = vadd.f32 %v668_v15, %v651_v44  ;;  %v2089_v5 = vmul.f32 %v1639_v19, %v2074_v3  ;;  %v2092_v37 = vmul.f32 %v1641_v20, %v437_v12  ;;  %v734_v0 = vmul.f32 %v1650_v24, %v2074_v3 }
  0x6a   : > { %1239 = vmatmul.msk.f32.gmra.mxu0 %vm305_vm0, %v879_v42  ;;  %v868_v40 = vadd.f32 %v1793_v23, %v848_v32  ;;  %v812_v46 = vadd.f32 %v796_v11, %v779_v59  ;;  %v566_v51 = vsel %vm487_vm4, %v522_v31, 0.0  ;;  %v767_v49 = vmul.f32 %v1652_v25, %v437_v12  ;;  %p1400_p6 = pneg %p1399_p5 }
  0x6b   : > { %v717_v47 = vadd.f32 %v701_v7, %v684_v45  ;;  %v622_v30 = vadd.f32 %v606_v35, %v589_v54  ;;  %v639_v61 = vmul.f32 %v1639_v19, %v566_v51  ;;  %v800_v44 = vmul.f32 %v1643_v21, %v1966_v56 }
  0x6c   : > { %v884_v42 = vmax.f32 %v868_v40, 0.0  ;;  %v845_v27 = vadd.f32 %v829_v50, %v812_v46  ;;  %v681_v11 = vadd.f32 %v1996_v26, %v1901_v36  ;;  %v698_v17 = vmul.f32 %v1627_v13, %v1876_v55  ;;  %p1405_p11 = pnand %p1404_p10, %p1400_p6 }
  0x6d   : > { %v750_v62 = vadd.f32 %v734_v0, %v717_v47  ;;  %v2110_v12 = vmul.f32 %v1650_v24, %v566_v51  ;;  %v833_v19 = vmul.f32 %v1734_v22, %v566_v51  ;;  %v764_v15 = vmul.f32 %v1652_v25, %v1983_v39 }
  0x6e   : > { %1244 = vmatmul.msk.f32.vlgmr.msra.gmra.mxu3 %vm305_vm0, %v884_v42  ;;  %v438_v32 = vrot.slane %v2048_v28, 7  ;;  %v865_v31 = vadd.f32 %v1793_v23, %v845_v27  ;;  %v714_v35 = vadd.f32 %v698_v17, %v681_v11  ;;  %v523_v36 = vrot.slane %v2102_v34, 1 }
  0x6f   : > { %v783_v54 = vadd.f32 %v767_v49, %v750_v62  ;;  %v2118_v26 = vadd.f32 %v639_v61, %v622_v30  ;;  %v586_v59 = vmul.f32 %v1632_v16, %v1983_v39  ;;  %v603_v50 = vmul.f32 %v1637_v18, %v1942_v38 }
  0x70   : > { %v439_v55 = vsel %vm404_vm1, %v436_v58, %v438_v32  ;;  %v747_v7 = vadd.f32 %v1999_v10, %v714_v35  ;;  %v797_v40 = vmul.f32 %v1643_v21, %v1942_v38  ;;  %v881_v58 = vmax.f32 %v865_v31, 0.0 }
  0x71   : > { %v816_v45 = vadd.f32 %v800_v44, %v783_v54  ;;  %v482_v0 = vsel %vm381_vm3, %v439_v55, 0.0  ;;  %v830_v39 = vmul.f32 %v1734_v22, %v1986_v43  ;;  %v619_v46 = vadd.f32 %v603_v50, %v586_v59  ;;  %v2149_v44 = vld [vmem:[#allocation2 + $0x98] sm:$0xff]  ;;  %v2171_v59 = vld [vmem:[#allocation2 + $0xa0] sm:$0xff] }
  0x72   : > { %1240 = vmatmul.msk.f32.gmra.mxu0 %vm305_vm0, %v880_v9  ;;  %v702_v51 = vmul.f32 %v1627_v13, %v1950_v60  ;;  %v780_v10 = vadd.f32 %v764_v15, %v747_v7  ;;  %v524_v49 = vsel %vm489_vm2, %v521_v6, %v523_v36  ;;  %v671_v38 = vmul.f32 %v1641_v20, %v482_v0 }
  0x73   : > { %v849_v47 = vadd.f32 %v833_v19, %v816_v45  ;;  %v652_v42 = vadd.f32 %v2007_v2, %v619_v46  ;;  %v768_v63 = vmul.f32 %v1652_v25, %v482_v0  ;;  %v682_v9 = vadd.f32 %v2053_v53, %v1938_v41 }
  0x74   : > { %v699_v43 = vmul.f32 %v1627_v13, %v1892_v57  ;;  %v813_v61 = vadd.f32 %v797_v40, %v780_v10  ;;  %v737_v60 = vmul.f32 %v1650_v24, %v524_v49  ;;  %v765_v6 = vmul.f32 %v1652_v25, %v2057_v1 }
  0x75   : > { %v869_v30 = vadd.f32 %v1793_v23, %v849_v47  ;;  %v685_v2 = vadd.f32 %v2013_v33, %v652_v42  ;;  %v798_v62 = vmul.f32 %v1643_v21, %v1944_v48  ;;  %v440_v57 = vrot.slane %v2102_v34, 7 }
  0x76   : > { %v715_v27 = vadd.f32 %v699_v43, %v682_v9  ;;  %v846_v53 = vadd.f32 %v830_v39, %v813_v61  ;;  %v525_v19 = vrot.slane %v2149_v44, 1  ;;  %v587_v15 = vmul.f32 %v1632_v16, %v2057_v1 }
  0x77   : > { %v885_v41 = vmax.f32 %v869_v30, 0.0  ;;  %v718_v11 = vadd.f32 %v702_v51, %v685_v2  ;;  %v801_v31 = vmul.f32 %v1643_v21, %v2048_v28  ;;  %v831_v54 = vmul.f32 %v1734_v22, %v2074_v3  ;;  %v1037_v30 = vld [vmem:[%s2349_s5 + $0x68] sm:$0xff] }
  0x78   : > { %v748_v17 = vadd.f32 %v2063_v4, %v715_v27  ;;  %v866_v33 = vadd.f32 %v1793_v23, %v846_v53  ;;  %v604_v35 = vmul.f32 %v1637_v18, %v1944_v48  ;;  %v441_v16 = vsel %vm404_vm1, %v438_v32, %v440_v57  ;;  %v377_v2 = vld [vmem:[#allocation2 + $0xa8] sm:$0xff]  ;;  %v1036_v53 = vld [vmem:[%s2349_s5 + $0x60] sm:$0xff] }
  0x79   : > { %1245 = vmatmul.msk.f32.gmra.mxu3 %vm305_vm0, %v885_v41  ;;  %v751_v4 = vadd.f32 %v2022_v52, %v718_v11  ;;  %v526_v1 = vsel %vm489_vm2, %v523_v36, %v525_v19  ;;  %v834_v50 = vmul.f32 %v1734_v22, %v524_v49  ;;  %v672_v7 = vmul.f32 %v1641_v20, %v441_v16  ;;  %v1039_v49 = vld [vmem:[%s2349_s5 + $0x78] sm:$0xff] }
  0x7a   : > { %1241 = vmatmul.msk.f32.gmra.mxu0 %vm305_vm0, %v881_v58  ;;  %v781_v55 = vadd.f32 %v765_v6, %v748_v17  ;;  %v620_v45 = vadd.f32 %v604_v35, %v587_v15  ;;  %v703_v3 = vmul.f32 %v1627_v13, %v1966_v56  ;;  %v882_v18 = vmax.f32 %v866_v33, 0.0  ;;  %1044 = vmatpush.msra.mxu1 %v1039_v49  ;;  %v1034_v35 = vld [vmem:[%s2349_s5 + $0x50] sm:$0xff] }
  0x7b   : > { %v784_v48 = vadd.f32 %v768_v63, %v751_v4  ;;  %v568_v52 = vsel %vm487_vm4, %v526_v1, 0.0  ;;  %v769_v36 = vmul.f32 %v1652_v25, %v441_v16  ;;  %v442_v0 = vrot.slane %v2149_v44, 7  ;;  %1260 = vmatpush.msra.mxu2 %v1039_v49  ;;  %1261 = vmatpush.msrb.mxu3 %v1039_v49  ;;  %v1033_v16 = vld [vmem:[%s2349_s5 + $0x48] sm:$0xff] }
  0x7c   : > { %v814_v40 = vadd.f32 %v798_v62, %v781_v55  ;;  %v653_v32 = vadd.f32 %v2089_v5, %v620_v45  ;;  %v527_v58 = vrot.slane %v2171_v59, 1  ;;  %v687_v20 = vadd.f32 %v671_v38, %v2044_v29  ;;  %v1038_v29 = vld [vmem:[%s2349_s5 + $0x70] sm:$0xff] }
  0x7d   : > { %v817_v39 = vadd.f32 %v801_v31, %v784_v48  ;;  %v704_v56 = vmul.f32 %v1627_v13, %v2048_v28  ;;  %v738_v47 = vmul.f32 %v1650_v24, %v568_v52  ;;  %v802_v5 = vmul.f32 %v1643_v21, %v2102_v34  ;;  %1045 = vmatpush.msra.mxu1 %v1038_v29 }
  0x7e   : > { %v847_v46 = vadd.f32 %v831_v54, %v814_v40  ;;  %v686_v51 = vadd.f32 %v2092_v37, %v653_v32  ;;  %v443_v10 = vsel %vm404_vm1, %v440_v57, %v442_v0  ;;  %v528_v37 = vsel %vm489_vm2, %v525_v19, %v527_v58  ;;  %1262 = vmatpush.msra.mxu2 %v1038_v29 }
  0x7f   : > { %v850_v38 = vadd.f32 %v834_v50, %v817_v39  ;;  %v484_v28 = vsel %vm381_vm3, %v443_v10, 0.0  ;;  %v720_v24 = vadd.f32 %v704_v56, %v687_v20  ;;  %v803_v9 = vmul.f32 %v1643_v21, %v2149_v44  ;;  %1046 = vmatpush.msra.mxu1 %v1037_v30  ;;  %1263 = vmatpush.msrb.mxu3 %v1038_v29  ;;  %v1025_v20 = vld [vmem:[%s2349_s5 + $0x8] sm:$0xff]  ;;  %v1379_v56 = vld [vmem:[%s2348_s4] ss:$0 sm:$0xff] }
  0x80   : > { %v719_v42 = vadd.f32 %v703_v3, %v686_v51  ;;  %v770_v63 = vmul.f32 %v1652_v25, %v484_v28  ;;  %v444_v43 = vrot.slane %v2171_v59, 7  ;;  %v867_v61 = vadd.f32 %v1793_v23, %v847_v46  ;;  %1264 = vmatpush.msra.mxu2 %v1037_v30  ;;  %v1026_v46 = vld [vmem:[%s2349_s5 + $0x10] sm:$0xff] }
  0x81   : > { %v870_v8 = vadd.f32 %v1793_v23, %v850_v38  ;;  %v753_v6 = vadd.f32 %v737_v60, %v720_v24  ;;  %v688_v62 = vadd.f32 %v672_v7, %v2118_v26  ;;  %v705_v41 = vmul.f32 %v1627_v13, %v2102_v34  ;;  %v1035_v26 = vld [vmem:[%s2349_s5 + $0x58] sm:$0xff]  ;;  %1047 = vmatpush.msra.mxu1 %v1036_v53  ;;  %v1032_v7 = vld [vmem:[%s2349_s5 + $0x40] sm:$0xff] }
  0x82   : > { %1242 = vmatmul.msk.f32.gmra.mxu0 %vm305_vm0, %v882_v18  ;;  %v752_v27 = vadd.f32 %v2110_v12, %v719_v42  ;;  %v445_v44 = vsel %vm404_vm1, %v442_v0, %v444_v43  ;;  %v835_v17 = vmul.f32 %v1734_v22, %v568_v52  ;;  %v529_v12 = vrot.slane %v377_v2, 1  ;;  %1266 = vmatpush.msra.mxu2 %v1036_v53  ;;  %v1029_v52 = vld [vmem:[%s2349_s5 + $0x28] sm:$0xff]  ;;  %v1027_v0 = vld [vmem:[%s2349_s5 + $0x18] sm:$0xff] }
  0x83   : > { %v886_v57 = vmax.f32 %v870_v8, 0.0  ;;  %v786_v11 = vadd.f32 %v770_v63, %v753_v6  ;;  %v721_v19 = vadd.f32 %v705_v41, %v688_v62  ;;  %v883_v13 = vmax.f32 %v867_v61, 0.0  ;;  %1265 = vmatpush.msrb.mxu3 %v1037_v30  ;;  %1048 = vmatpush.msra.mxu1 %v1035_v26 }
  0x84   : > { %v785_v60 = vadd.f32 %v769_v36, %v752_v27  ;;  %v836_v34 = vmul.f32 %v1734_v22, %v528_v37  ;;  %v771_v15 = vmul.f32 %v1652_v25, %v445_v44  ;;  %v530_v55 = vsel %vm489_vm2, %v527_v58, %v529_v12  ;;  %1268 = vmatpush.msra.mxu2 %v1035_v26 }
  0x85   : > { %1246 = vmatmul.msk.f32.gmra.mxu3 %vm305_vm0, %v886_v57  ;;  %v819_v31 = vadd.f32 %v803_v9, %v786_v11  ;;  %v754_v54 = vadd.f32 %v738_v47, %v721_v19  ;;  %v804_v25 = vmul.f32 %v1643_v21, %v2171_v59  ;;  %1049 = vmatpush.msra.mxu1 %v1034_v35  ;;  %v570_v3 = vsel %vm487_vm4, %v530_v55, 0.0  ;;  %v1031_v21 = vld [vmem:[%s2349_s5 + $0x38] sm:$0xff] }
  0x86   : > { %v818_v33 = vadd.f32 %v802_v5, %v785_v60  ;;  %1267 = vmatpush.msrb.mxu3 %v1036_v53  ;;  %1270 = vmatpush.msra.mxu2 %v1034_v35  ;;  %v837_v40 = vmul.f32 %v1734_v22, %v570_v3  ;;  %v1028_v22 = vld [vmem:[%s2349_s5 + $0x20] sm:$0xff] }
  0x87   : > { %v852_v50 = vadd.f32 %v836_v34, %v819_v31  ;;  %v787_v45 = vadd.f32 %v771_v15, %v754_v54  ;;  %1050 = vmatpush.msra.mxu1 %v1033_v16 }
  0x88   : > { %v851_v4 = vadd.f32 %v835_v17, %v818_v33  ;;  %1269 = vmatpush.msrb.mxu3 %v1035_v26  ;;  %1272 = vmatpush.msra.mxu2 %v1033_v16 }
  0x89   : > { %1051 = vmatpush.msra.mxu1 %v1032_v7  ;;  %v872_v59 = vadd.f32 %v1793_v23, %v852_v50  ;;  %v820_v48 = vadd.f32 %v804_v25, %v787_v45 }
  0x8a   : > { %1243 = vmatmul.msk.f32.gmra.mxu0 %vm305_vm0, %v883_v13  ;;  %v871_v1 = vadd.f32 %v1793_v23, %v851_v4  ;;  %1271 = vmatpush.msrb.mxu3 %v1034_v35 }
  0x8b   : > { %1274 = vmatpush.msra.mxu2 %v1032_v7  ;;  %1052 = vmatpush.msra.mxu1 %v1031_v21  ;;  %v888_v32 = vmax.f32 %v872_v59, 0.0  ;;  %v853_v36 = vadd.f32 %v837_v40, %v820_v48 }
  0x8c   : > { %v887_v18 = vmax.f32 %v871_v1, 0.0  ;;  %1273 = vmatpush.msrb.mxu3 %v1033_v16 }
  0x8d   : > { %1276 = vmatpush.msra.mxu2 %v1031_v21  ;;  %1053 = vmatpush.msra.mxu1 %v1030_v14  ;;  %v873_v58 = vadd.f32 %v1793_v23, %v853_v36  ;;  %v1024_v23 = vld [vmem:[%s2349_s5] sm:$0xff] }
  0x8e   : > { %1247 = vmatmul.msk.f32.gmra.mxu3 %vm305_vm0, %v887_v18 }
  0x8f   : > { %1275 = vmatpush.msrb.mxu3 %v1032_v7  ;;  %1278 = vmatpush.msra.mxu2 %v1030_v14  ;;  %v889_v39 = vmax.f32 %v873_v58, 0.0 }
  0x90   : > { %1054 = vmatpush.msra.mxu1 %v1029_v52 }
  0x91   : > { %1277 = vmatpush.msrb.mxu3 %v1031_v21  ;;  %1280 = vmatpush.msra.mxu2 %v1029_v52  ;;  %v1380_v21 = vld [vmem:[%s2350_s6] ss:$0 sm:$0xff] }
  0x92   : > { %1055 = vmatpush.msra.mxu1 %v1028_v22 }
  0x93   : > { %1279 = vmatpush.msrb.mxu3 %v1030_v14  ;;  %1282 = vmatpush.msra.mxu2 %v1028_v22 }
  0x94   : > { %1056 = vmatpush.msra.mxu1 %v1027_v0 }
  0x95   : > { %1281 = vmatpush.msrb.mxu3 %v1029_v52  ;;  %1284 = vmatpush.msra.mxu2 %v1027_v0 }
  0x96   : > { %1248 = vmatmul.msk.f32.gmra.mxu3 %vm305_vm0, %v888_v32  ;;  %1057 = vmatpush.msra.mxu1 %v1026_v46 }
  0x97   : > { %1283 = vmatpush.msrb.mxu3 %v1028_v22  ;;  %1286 = vmatpush.msra.mxu2 %v1026_v46 }
  0x98   : > { %1058 = vmatpush.msra.mxu1 %v1025_v20 }
  0x99   : > { %1285 = vmatpush.msrb.mxu3 %v1027_v0  ;;  %1288 = vmatpush.msra.mxu2 %v1025_v20 }
  0x9a   : > { %1059 = vmatpush.msra.mxu1 %v1024_v23 }
  0x9b   : > { %1287 = vmatpush.msrb.mxu3 %v1026_v46  ;;  %1290 = vmatpush.msra.mxu2 %v1024_v23 }
  0x9d   : > { %1289 = vmatpush.msrb.mxu3 %v1025_v20 }
  0x9e   : > { %1249 = vmatmul.msk.f32.gmra.mxu3 %vm305_vm0, %v889_v39 }
  0x9f   : > { %1291 = vmatpush.msrb.mxu3 %v1024_v23 }
  0xbf   : > { %v960_v51 = vpop.f32.mrf.mxu0 }
  0xc0   : > { %v961_v47 = vadd.f32 %v1379_v56, %v960_v51 }
  0xc2   : > { %v1008_v5 = vmax.f32 %v961_v47, 0.0 }
  0xc4   : > { %1060 = vmatmul.f32.vlgmr.msra.gmra.mxu1 %v1008_v5 }
  0xc7   : > { %v963_v10 = vpop.f32.mrf.mxu0 }
  0xc8   : > { %v964_v49 = vadd.f32 %v1379_v56, %v963_v10 }
  0xca   : > { %v1009_v29 = vmax.f32 %v964_v49, 0.0 }
  0xcc   : > { %1063 = vmatmul.f32.gmra.mxu1 %v1009_v29 }
  0xcf   : > { %v966_v38 = vpop.f32.mrf.mxu0 }
  0xd0   : > { %v967_v28 = vadd.f32 %v1379_v56, %v966_v38 }
  0xd2   : > { %v1010_v37 = vmax.f32 %v967_v28, 0.0 }
  0xd4   : > { %1066 = vmatmul.f32.gmra.mxu1 %v1010_v37 }
  0xd7   : > { %v969_v24 = vpop.f32.mrf.mxu0 }
  0xd8   : > { %v970_v42 = vadd.f32 %v1379_v56, %v969_v24 }
  0xda   : > { %v1011_v63 = vmax.f32 %v970_v42, 0.0 }
  0xdc   : > { %1069 = vmatmul.f32.gmra.mxu1 %v1011_v63 }
  0xdf   : > { %v972_v9 = vpop.f32.mrf.mxu0 }
  0xe0   : > { %v973_v43 = vadd.f32 %v1379_v56, %v972_v9 }
  0xe2   : > { %v1012_v30 = vmax.f32 %v973_v43, 0.0 }
  0xe4   : > { %1072 = vmatmul.f32.gmra.mxu1 %v1012_v30 }
  0xe7   : > { %v975_v8 = vpop.f32.mrf.mxu0 }
  0xe8   : > { %v976_v61 = vadd.f32 %v1379_v56, %v975_v8 }
  0xea   : > { %v1013_v6 = vmax.f32 %v976_v61, 0.0 }
  0xec   : > { %1075 = vmatmul.f32.gmra.mxu1 %v1013_v6 }
  0xef   : > { %v978_v2 = vpop.f32.mrf.mxu0 }
  0xf0   : > { %v979_v27 = vadd.f32 %v1379_v56, %v978_v2 }
  0xf1   : > { %v990_v62 = vpop.f32.mrf.mxu3 }
  0xf2   : > { %v1014_v44 = vmax.f32 %v979_v27, 0.0  ;;  %v991_v15 = vadd.f32 %v1379_v56, %v990_v62 }
  0xf4   : > { %1078 = vmatmul.f32.vlgmr.msra.gmra.mxu2 %v1014_v44  ;;  %v1018_v33 = vmax.f32 %v991_v15, 0.0 }
  0xf7   : > { %v981_v41 = vpop.f32.mrf.mxu0 }
  0xf8   : > { %v982_v53 = vadd.f32 %v1379_v56, %v981_v41 }
  0xfa   : > { %v1015_v57 = vmax.f32 %v982_v53, 0.0 }
  0xfc   : > { %1081 = vmatmul.f32.gmra.mxu2 %v1015_v57  ;;  %v993_v60 = vpop.f32.mrf.mxu3 }
  0xfd   : > { %v994_v4 = vadd.f32 %v1379_v56, %v993_v60 }
  0xff   : > { %v984_v11 = vpop.f32.mrf.mxu0  ;;  %v1019_v55 = vmax.f32 %v994_v4, 0.0 }
 0x100   : > { %v985_v17 = vadd.f32 %v1379_v56, %v984_v11 }
 0x102   : > { %v1016_v12 = vmax.f32 %v985_v17, 0.0 }
 0x104   : > { %1084 = vmatmul.f32.gmra.mxu2 %v1016_v12 }
 0x107   : > { %v987_v19 = vpop.f32.mrf.mxu0 }
 0x108   : > { %v988_v26 = vadd.f32 %v1379_v56, %v987_v19  ;;  %v996_v13 = vpop.f32.mrf.mxu3 }
 0x109   : > { %v997_v50 = vadd.f32 %v1379_v56, %v996_v13 }
 0x10a   : > { %v1017_v34 = vmax.f32 %v988_v26, 0.0 }
 0x10b   : > { %v1020_v45 = vmax.f32 %v997_v50, 0.0 }
 0x10c   : > { %1087 = vmatmul.f32.gmra.mxu2 %v1017_v34 }
 0x111   : > { %v999_v31 = vpop.f32.mrf.mxu3 }
 0x112   : > { %v1000_v54 = vadd.f32 %v1379_v56, %v999_v31 }
 0x114   : > { %1090 = vmatmul.f32.gmra.mxu2 %v1018_v33  ;;  %v1021_v35 = vmax.f32 %v1000_v54, 0.0 }
 0x116   : > { %1099 = vmatmul.f32.vlgmr.msrb.gmra.mxu3 %v1021_v35 }
 0x119   : > { %v1002_v16 = vpop.f32.mrf.mxu3 }
 0x11a   : > { %v1003_v25 = vadd.f32 %v1379_v56, %v1002_v16 }
 0x11c   : > { %1093 = vmatmul.f32.gmra.mxu2 %v1019_v55  ;;  %v1022_v1 = vmax.f32 %v1003_v25, 0.0 }
 0x11e   : > { %1102 = vmatmul.f32.gmra.mxu3 %v1022_v1 }
 0x121   : > { %v1005_v7 = vpop.f32.mrf.mxu3 }
 0x122   : > { %v1006_v3 = vadd.f32 %v1379_v56, %v1005_v7 }
 0x124   : > { %1096 = vmatmul.f32.gmra.mxu2 %v1020_v45  ;;  %v1023_v18 = vmax.f32 %v1006_v3, 0.0 }
 0x126   : > { %1105 = vmatmul.f32.gmra.mxu3 %v1023_v18 }
 0x141   : > { %v1061_v59 = vpop.f32.mrf.mxu1 }
 0x142   : > { %v1062_v48 = vadd.f32 %v1380_v21, %v1061_v59 }
 0x144   : > { %1109 = vst [vmem:[%s2280_s22] sm:$0xff] %v1062_v48 }
 0x149   : > { %v1064_v40 = vpop.f32.mrf.mxu1 }
 0x14a   : > { %v1065_v14 = vadd.f32 %v1380_v21, %v1064_v40 }
 0x14c   : > { %1110 = vst [vmem:[%s2280_s22 + $0x8] sm:$0xff] %v1065_v14 }
 0x151   : > { %v1067_v52 = vpop.f32.mrf.mxu1 }
 0x152   : > { %v1068_v32 = vadd.f32 %v1380_v21, %v1067_v52 }
 0x154   : > { %1111 = vst [vmem:[%s2280_s22 + $0x10] sm:$0xff] %v1068_v32 }
 0x159   : > { %v1070_v36 = vpop.f32.mrf.mxu1 }
 0x15a   : > { %v1071_v22 = vadd.f32 %v1380_v21, %v1070_v36 }
 0x15c   : > { %1112 = vst [vmem:[%s2280_s22 + $0x18] sm:$0xff] %v1071_v22 }
 0x161   : > { %v1073_v0 = vpop.f32.mrf.mxu1 }
 0x162   : > { %v1074_v58 = vadd.f32 %v1380_v21, %v1073_v0 }
 0x164   : > { %1113 = vst [vmem:[%s2280_s22 + $0x20] sm:$0xff] %v1074_v58 }
 0x169   : > { %v1076_v39 = vpop.f32.mrf.mxu1 }
 0x16a   : > { %v1077_v46 = vadd.f32 %v1380_v21, %v1076_v39 }
 0x16c   : > { %1114 = vst [vmem:[%s2280_s22 + $0x28] sm:$0xff] %v1077_v46 }
 0x177   : > { %v1079_v20 = vpop.f32.mrf.mxu2 }
 0x178   : > { %v1080_v23 = vadd.f32 %v1380_v21, %v1079_v20 }
 0x17a   : > { %1115 = vst [vmem:[%s2280_s22 + $0x30] sm:$0xff] %v1080_v23 }
 0x17f   : > { %v1082_v56 = vpop.f32.mrf.mxu2 }
 0x180   : > { %v1083_v51 = vadd.f32 %v1380_v21, %v1082_v56 }
 0x182   : > { %1116 = vst [vmem:[%s2280_s22 + $0x38] sm:$0xff] %v1083_v51 }
 0x187   : > { %v1085_v47 = vpop.f32.mrf.mxu2 }
 0x188   : > { %v1086_v5 = vadd.f32 %v1380_v21, %v1085_v47 }
 0x18a   : > { %1117 = vst [vmem:[%s2280_s22 + $0x40] sm:$0xff] %v1086_v5 }
 0x18f   : > { %v1088_v10 = vpop.f32.mrf.mxu2 }
 0x190   : > { %v1089_v49 = vadd.f32 %v1380_v21, %v1088_v10 }
 0x192   : > { %1118 = vst [vmem:[%s2280_s22 + $0x48] sm:$0xff] %v1089_v49 }
 0x197   : > { %v1091_v29 = vpop.f32.mrf.mxu2 }
 0x198   : > { %v1092_v38 = vadd.f32 %v1380_v21, %v1091_v29 }
 0x199   : > { %v1100_v28 = vpop.f32.mrf.mxu3 }
 0x19a   : > { %1119 = vst [vmem:[%s2280_s22 + $0x50] sm:$0xff] %v1092_v38  ;;  %v1101_v37 = vadd.f32 %v1380_v21, %v1100_v28 }
 0x19c   : > { %1122 = vst [vmem:[%s2280_s22 + $0x68] sm:$0xff] %v1101_v37 }
 0x19f   : > { %v1094_v24 = vpop.f32.mrf.mxu2 }
 0x1a0   : > { %v1095_v42 = vadd.f32 %v1380_v21, %v1094_v24 }
 0x1a1   : > { %v1103_v63 = vpop.f32.mrf.mxu3 }
 0x1a2   : > { %1120 = vst [vmem:[%s2280_s22 + $0x58] sm:$0xff] %v1095_v42  ;;  %v1104_v9 = vadd.f32 %v1380_v21, %v1103_v63 }
 0x1a4   : > { %1123 = vst [vmem:[%s2280_s22 + $0x70] sm:$0xff] %v1104_v9 }
 0x1a7   : > { %v1097_v43 = vpop.f32.mrf.mxu2 }
 0x1a8   : > { %v1098_v30 = vadd.f32 %v1380_v21, %v1097_v43 }
 0x1a9   : > { %v1106_v8 = vpop.f32.mrf.mxu3 }
 0x1aa   : > { %1121 = vst [vmem:[%s2280_s22 + $0x60] sm:$0xff] %v1098_v30  ;;  %v1107_v61 = vadd.f32 %v1380_v21, %v1106_v8 }
 0x1ac   : > { %1124 = vst [vmem:[%s2280_s22 + $0x78] sm:$0xff] %v1107_v61 }
 0x1ad   : > { %1408 = shalt.err (!%p1405_p11)
}
 0x1ae   : > { %s1477_s21 = smov 128   ;;  %s1478_s22 = smov 8  }
 0x1af   : > { %1292 = dma.vmem_to_hbm [thread:$0]  (%p1570_p3), %s1142_s27, 2048, %s1144_s23, %s1126_s28, %s1477_s21, %s1477_s21, %s1478_s22  }
 0x1b0 PF: > { %p1298_p12 = scmp.ge.s32.totalorder %s1475_s8, 2  ;;  %s1158_s13 = sand.u32 1, %s1447_s24  }
 0x1b1   : > { %s1159_s16 = scalar_lea.sflag [#allocation4], %s1158_s13 }
 0x1b2   : > { %p1295_p13 = pnand %p1298_p12, %p1579_p8 }
 0x1b4   : > { %p1296_p0 = pneg %p1295_p13 }
 0x1b6   : > { %1442 = dma.done.wait (%p1296_p0), %s1159_s16, 2048  }
 0x1b7   : > { %1444 = vsyncadd (%p1296_p0), %s1159_s16, 4294965248  ;;  %s20_s8 = sadd.s32 1, %s1475_s8   ;;  %s2356_s24 = smov %s1451_s25 }
 0x1b8   : > { %p17_p1 = scmp.ge.s32.totalorder %s20_s8, 6   ;;  %s2357_s25 = smov %s1455_s26 }
 0x1b9   : > { %s2358_s26 = smov %s1588_s19  ;;  %s2359_s27 = smov %s1467_s29 }
 0x1ba   : > { %s2360_s28 = smov %s1471_s30  ;;  %s2361_s29 = smov %s2364_s11 }
 0x1bb   : > { %s2362_s30 = smov %s2368_s12  ;;  %19 = sbr.rel (!%p17_p1) target bundleno = 5 (0x5), region = 86 }
 0x1c0   :  { %1165 = vsyncpa [#allocation4], 1 }
 0x1c1   :  { %1167 = vsyncpa [#allocation4 + $0x1], 1 }

</bundles_post_ra>
